<compile_context>
chip_gen: v6e
topology: v6e:2x2x1
jax: 0.10.0
libtpu: 0.0.40
codegen_flags: <defaults>
</compile_context>

<pallas_src>
import jax
import jax.numpy as jnp
from jax import lax
from jax.experimental import pallas as pl
from jax.experimental.pallas import tpu as pltpu

_SUBLANE = 8
_VMEM_LIMIT_BYTES = 40 << 20    # raise v5e's 16 MiB default scoped limit; < v7x's 64 MiB physical
_VMEM_WORKSET_BYTES = 28 << 20  # target working set used when capping tile_b


def _round_up(n, m):
    return ((n + m - 1) // m) * m


def _leaky_relu(v, slope=0.2):
    return jnp.where(v > 0, v, slope * v)


def cgan_disc_kernel(x_ref, y_ref, ws_ref, bs_ref, wl_ref, bl_ref,
                     w1_ref, b1_ref, w2_ref, b2_ref, out_ref):
    """One batch tile, computed transposed (features on sublanes, batch on
    lanes) so every activation and the final output store is lane-dense."""
    dn = (((1,), (1,)), ((), ()))          # contract the feature axis of x / y

    # sample_block / label_block: h^T = LeakyReLU(W^T @ x^T + b^T).
    xb = x_ref[...].astype(jnp.bfloat16)                           # (TB, sd)
    yb = y_ref[...].astype(jnp.bfloat16)                           # (TB, ld)
    hx = lax.dot_general(ws_ref[...], xb, dimension_numbers=dn,
                         preferred_element_type=jnp.float32)       # (2h, TB)
    hy = lax.dot_general(wl_ref[...], yb, dimension_numbers=dn,
                         preferred_element_type=jnp.float32)       # (2h, TB)
    hx = _leaky_relu(hx + bs_ref[...])
    hy = _leaky_relu(hy + bl_ref[...])

    # torch.cat([x, y], dim=1)  ->  stack on the sublane (feature) axis.
    h = jnp.concatenate([hx, hy], axis=0).astype(jnp.bfloat16)     # (4h, TB)

    # sequence Linear(4h -> 2h); Dropout(0.4) is identity at inference.
    h1 = jnp.dot(w1_ref[...], h, preferred_element_type=jnp.float32)  # (2h, TB)
    h1 = _leaky_relu(h1 + b1_ref[...])

    # sequence Linear(2h -> 1) + Sigmoid: VPU multiply + sublane reduce
    # (cheaper than an N=1 MXU pass); b2 is a scalar in SMEM.
    logit = jnp.sum(h1 * w2_ref[...], axis=0, keepdims=True) + b2_ref[0]
    out_ref[...] = jax.nn.sigmoid(logit).reshape(out_ref.shape)


def prepare_params(params, *, hidden_multiple=128):
    """One-time conversion of f32 params into kernel-ready operands.

    - Transposes every Linear weight to [out, in] so the kernel keeps the
      batch on the lane axis.
    - Zero-pads the hidden dims (2h / 4h) up to `hidden_multiple` so the W1
      matmul uses full MXU tiles (128 for v5e; use 256 on v6e/v7x for large
      hidden).  Zero padding is inert: LeakyReLU(0)=0 and padded weights are 0.
    - Matmul weights bf16; biases and the final 2h->1 column stay f32.
    """
    (ws, bs, wl, bl, w1, b1, w2, b2) = params
    sample_dim, two_h = ws.shape
    label_dim = wl.shape[0]
    two_h_p = _round_up(two_h, hidden_multiple)
    four_h_p = 2 * two_h_p
    pad_h = two_h_p - two_h

    def pad_rows_t(w):   # [in, out] -> [out_p, in], zero-padded output rows
        return jnp.pad(w.T, ((0, pad_h), (0, 0)))

    ws_t = pad_rows_t(ws).astype(jnp.bfloat16)                 # (2h_p, sd)
    wl_t = pad_rows_t(wl).astype(jnp.bfloat16)                 # (2h_p, ld)
    bs_t = jnp.pad(bs.T, ((0, pad_h), (0, 0)))                 # (2h_p, 1) f32
    bl_t = jnp.pad(bl.T, ((0, pad_h), (0, 0)))                 # (2h_p, 1) f32

    # W1^T: columns 0:2h act on hx, columns 2h_p:2h_p+2h act on hy.
    w1_t = jnp.zeros((two_h_p, four_h_p), jnp.float32)
    w1_t = w1_t.at[:two_h, :two_h].set(w1.T[:, :two_h])
    w1_t = w1_t.at[:two_h, two_h_p:two_h_p + two_h].set(w1.T[:, two_h:])
    w1_t = w1_t.astype(jnp.bfloat16)                           # (2h_p, 4h_p)
    b1_t = jnp.pad(b1.T, ((0, pad_h), (0, 0)))                 # (2h_p, 1) f32

    w2_c = jnp.pad(w2, ((0, pad_h), (0, 0))).astype(jnp.float32)   # (2h_p, 1)
    b2_s = b2.reshape(-1).astype(jnp.float32)                      # (1,) -> SMEM
    return (ws_t, bs_t, wl_t, bl_t, w1_t, b1_t, w2_c, b2_s)


def _pick_tile_b(B, sample_dim, label_dim, two_h_p, *,
                 tile_b_request=4096, vmem_workset_bytes=_VMEM_WORKSET_BYTES):
    """Batch tile: big enough to amortize the ~0.35us per-grid-step cost and
    give the DMA engine wide transfers, small enough that double-buffered
    streamed tiles + resident weights + f32 intermediates fit a VMEM budget
    safe on all generations, and split so large batches give v7x's two
    TensorCores an even number of grid steps."""
    four_h_p = 2 * two_h_p
    # Approximate per-batch-row VMEM bytes: double-buffered f32 x/y/out tiles,
    # their bf16 in-kernel copies, and f32 intermediates h / h1 (+ temps).
    per_row = 10 * (sample_dim + label_dim) + 8 + 6 * four_h_p + 6 * two_h_p
    # Resident weights/biases; assume worst-case depth-2 buffering.
    resident = 2 * (2 * two_h_p * (sample_dim + label_dim + four_h_p)
                    + 4 * 4 * two_h_p)
    avail = max(vmem_workset_bytes - resident, 2 << 20)
    cap = max(256, (avail // per_row) // 256 * 256)
    tile_b = min(tile_b_request, cap)

    if B <= tile_b and B <= 2048:
        return _round_up(max(B, _SUBLANE), _SUBLANE)   # tiny batch: one tile
    num_tiles = max(pl.cdiv(B, tile_b), 2)             # >= 2 steps (v7x megacore)
    if num_tiles % 2:
        num_tiles += 1                                 # even split across 2 TCs
    return _round_up(pl.cdiv(B, num_tiles), 256)


def _pallas_forward(x_pad, y_pad, prepared, tile_b, num_tiles,
                    single_buffer_weights):
    (ws_t, bs_t, wl_t, bl_t, w1_t, b1_t, w2_c, b2_s) = prepared
    sample_dim = x_pad.shape[1]
    label_dim = y_pad.shape[1]
    two_h_p = ws_t.shape[0]
    four_h_p = w1_t.shape[1]

    def resident(shape):
        # Grid-invariant operand (index_map pinned to block (0, 0)): request
        # single buffering — it is never re-fetched, so depth-2 pipelining only
        # doubles its VMEM footprint.
        if single_buffer_weights:
            return pl.BlockSpec(shape, lambda i: (0, 0),
                                pipeline_mode=pl.Buffered(1))
        return pl.BlockSpec(shape, lambda i: (0, 0))

    # If a trace shows exposed DMA on the streamed x/y tiles (small-hidden
    # configs), deepen their pipeline here with pipeline_mode=pl.Buffered(3).
    grid_spec = pltpu.PrefetchScalarGridSpec(
        num_scalar_prefetch=0,
        grid=(num_tiles,),
        in_specs=[
            pl.BlockSpec((tile_b, sample_dim), lambda i: (i, 0)),  # streamed x
            pl.BlockSpec((tile_b, label_dim), lambda i: (i, 0)),   # streamed y
            resident((two_h_p, sample_dim)),                       # Ws^T
            resident((two_h_p, 1)),                                # bs^T
            resident((two_h_p, label_dim)),                        # Wl^T
            resident((two_h_p, 1)),                                # bl^T
            resident((two_h_p, four_h_p)),                         # W1^T
            resident((two_h_p, 1)),                                # b1^T
            resident((two_h_p, 1)),                                # w2 column
            pl.BlockSpec(memory_space=pltpu.MemorySpace.SMEM),     # scalar b2
        ],
        out_specs=pl.BlockSpec((1, 1, tile_b), lambda i: (i, 0, 0)),
    )
    return pl.pallas_call(
        cgan_disc_kernel,
        out_shape=jax.ShapeDtypeStruct((num_tiles, 1, tile_b), jnp.float32),
        grid_spec=grid_spec,
        compiler_params=pltpu.CompilerParams(
            dimension_semantics=("parallel",),
            vmem_limit_bytes=_VMEM_LIMIT_BYTES),
    )(x_pad, y_pad, ws_t, bs_t, wl_t, bl_t, w1_t, b1_t, w2_c, b2_s)


def cgan_discriminator(x, y, prepared, *, tile_b=4096):
    """x: [B, sample_dim], y: [B, label_dim] (f32). Returns [B, 1] validity."""
    B = x.shape[0]
    sample_dim = x.shape[1]
    label_dim = y.shape[1]
    two_h_p = prepared[0].shape[0]

    tile_b = _pick_tile_b(B, sample_dim, label_dim, two_h_p,
                          tile_b_request=tile_b)
    b_pad = _round_up(B, tile_b)
    num_tiles = b_pad // tile_b

    # x / y are streamed as-is (row-major f32; bf16 cast happens in-kernel).
    # Zero-pad the batch only when it is not tile-aligned (no-op otherwise).
    if b_pad != B:
        x = jnp.pad(x, ((0, b_pad - B), (0, 0)))
        y = jnp.pad(y, ((0, b_pad - B), (0, 0)))

    try:
        out = _pallas_forward(x, y, prepared, tile_b, num_tiles,
                              single_buffer_weights=True)
    except Exception:
        # Fallback for jax versions that reject pipeline_mode=pl.Buffered(1)
        # on top-level pallas_call BlockSpecs (default double-buffered weights).
        out = _pallas_forward(x, y, prepared, tile_b, num_tiles,
                              single_buffer_weights=False)

    # Lane-dense (num_tiles, 1, tile_b) -> [B, 1]
    return out.reshape(b_pad, 1)[:B]


def init_params(key, sample_dim, label_dim, hidden_dim_base):
    """Synthetic f32 parameters matching the PyTorch module's shapes.

    Weights stored as [in_features, out_features]; biases as [1, out]."""
    two_h = 2 * hidden_dim_base
    four_h = 4 * hidden_dim_base
    ks = jax.random.split(key, 8)
    f32 = jnp.float32

    def lin(kw, kb, d_in, d_out):
        w = jax.random.normal(kw, (d_in, d_out), f32) * 0.05
        b = jax.random.normal(kb, (1, d_out), f32) * 0.05
        return w, b

    ws, bs = lin(ks[0], ks[1], sample_dim, two_h)   # sample_block Linear
    wl, bl = lin(ks[2], ks[3], label_dim, two_h)    # label_block Linear
    w1, b1 = lin(ks[4], ks[5], four_h, two_h)       # sequence Linear 1
    w2, b2 = lin(ks[6], ks[7], two_h, 1)            # sequence Linear 2
    return (ws, bs, wl, bl, w1, b1, w2, b2)


def reference_forward(x, y, params):
    """Pure-JAX reference replicating the PyTorch forward (eval mode).

    Matmul operands are rounded to bf16 (as in the kernel) so the comparison
    measures kernel correctness rather than bf16 weight quantization."""
    (ws, bs, wl, bl, w1, b1, w2, b2) = params
    bf = lambda a: a.astype(jnp.bfloat16).astype(jnp.float32)
    lrelu = lambda v: jnp.where(v > 0, v, 0.2 * v)
    hx = lrelu(bf(x) @ bf(ws) + bs)
    hy = lrelu(bf(y) @ bf(wl) + bl)
    h = jnp.concatenate([hx, hy], axis=1)
    h1 = lrelu(bf(h) @ bf(w1) + b1)          # Dropout(0.4) = identity (eval)
    return jax.nn.sigmoid(h1 @ w2 + b2)


if __name__ == "__main__":
    # Small shapes consistent with the module.
    B = 2
    sample_dim = 16
    label_dim = 8
    hidden_dim_base = 16  # -> 2h = 32, 4h = 64

    key = jax.random.PRNGKey(0)
    kx, ky, kp = jax.random.split(key, 3)
    x = jax.random.normal(kx, (B, sample_dim), jnp.float32)
    y = jax.random.normal(ky, (B, label_dim), jnp.float32)
    params = init_params(kp, sample_dim, label_dim, hidden_dim_base)
    prepared = prepare_params(params)   # one-time prep (transpose + pad + bf16)

    out = cgan_discriminator(x, y, prepared)
    out = jax.block_until_ready(out)

    ref = reference_forward(x, y, params)
    assert out.shape == (B, 1), out.shape
    assert jnp.allclose(out, ref, atol=2e-3, rtol=2e-3), (out, ref)

    print("KERNEL_OK")
</pallas_src>

<mosaic_0001>
module attributes {stable_mosaic.version = 11 : i64} {
  func.func @cgan_disc_kernel(%arg0: i32, %arg1: memref<8x16xf32, #tpu.memory_space<vmem>>, %arg2: memref<8x8xf32, #tpu.memory_space<vmem>>, %arg3: memref<128x16xbf16, #tpu.memory_space<vmem>>, %arg4: memref<128x1xf32, #tpu.memory_space<vmem>>, %arg5: memref<128x8xbf16, #tpu.memory_space<vmem>>, %arg6: memref<128x1xf32, #tpu.memory_space<vmem>>, %arg7: memref<128x256xbf16, #tpu.memory_space<vmem>>, %arg8: memref<128x1xf32, #tpu.memory_space<vmem>>, %arg9: memref<128x1xf32, #tpu.memory_space<vmem>>, %arg10: memref<1xf32, #tpu.memory_space<smem>>, %arg11: memref<1x1x8xf32, #tpu.memory_space<vmem>>) attributes {dimension_semantics = [#tpu.dimension_semantics<parallel>], iteration_bounds = array<i64: 1>, scalar_prefetch = 0 : i64, scratch_operands = 0 : i64, tpu.core_type = #tpu.core_type<tc>, window_params = [{transform_indices = @transform_0, window_bounds = array<i64: 8, 16>}, {transform_indices = @transform_1, window_bounds = array<i64: 8, 8>}, {pipeline_mode = #tpu.pipeline_mode<synchronous>, transform_indices = @transform_2, window_bounds = array<i64: 128, 16>}, {pipeline_mode = #tpu.pipeline_mode<synchronous>, transform_indices = @transform_3, window_bounds = array<i64: 128, 1>}, {pipeline_mode = #tpu.pipeline_mode<synchronous>, transform_indices = @transform_4, window_bounds = array<i64: 128, 8>}, {pipeline_mode = #tpu.pipeline_mode<synchronous>, transform_indices = @transform_5, window_bounds = array<i64: 128, 1>}, {pipeline_mode = #tpu.pipeline_mode<synchronous>, transform_indices = @transform_6, window_bounds = array<i64: 128, 256>}, {pipeline_mode = #tpu.pipeline_mode<synchronous>, transform_indices = @transform_7, window_bounds = array<i64: 128, 1>}, {pipeline_mode = #tpu.pipeline_mode<synchronous>, transform_indices = @transform_8, window_bounds = array<i64: 128, 1>}, {transform_indices = @transform_9, window_bounds = array<i64: 1>}, {transform_indices = @transform_10, window_bounds = array<i64: 1, 1, 8>}]} {
    %c0 = arith.constant 0 : index
    %c0_0 = arith.constant 0 : index
    %0 = vector.load %arg1[%c0, %c0_0] : memref<8x16xf32, #tpu.memory_space<vmem>>, vector<8x16xf32>
    %1 = arith.truncf %0 : vector<8x16xf32> to vector<8x16xbf16>
    %c0_1 = arith.constant 0 : index
    %c0_2 = arith.constant 0 : index
    %2 = vector.load %arg2[%c0_1, %c0_2] : memref<8x8xf32, #tpu.memory_space<vmem>>, vector<8x8xf32>
    %3 = arith.truncf %2 : vector<8x8xf32> to vector<8x8xbf16>
    %c0_3 = arith.constant 0 : index
    %c0_4 = arith.constant 0 : index
    %4 = vector.load %arg3[%c0_3, %c0_4] : memref<128x16xbf16, #tpu.memory_space<vmem>>, vector<128x16xbf16>
    %cst = arith.constant dense<0.000000e+00> : vector<128x8xf32>
    %5 = tpu.matmul %4, %1, %cst {dimension_numbers = #tpu.dot_dimension_numbers<[1], [1], [0], [0], [0, 0, 1, 0], [], []>} : vector<128x16xbf16>, vector<8x16xbf16>, vector<128x8xf32> -> vector<128x8xf32>
    %c0_5 = arith.constant 0 : index
    %c0_6 = arith.constant 0 : index
    %6 = vector.load %arg5[%c0_5, %c0_6] : memref<128x8xbf16, #tpu.memory_space<vmem>>, vector<128x8xbf16>
    %cst_7 = arith.constant dense<0.000000e+00> : vector<128x8xf32>
    %7 = tpu.matmul %6, %3, %cst_7 {dimension_numbers = #tpu.dot_dimension_numbers<[1], [1], [0], [0], [0, 0, 1, 0], [], []>} : vector<128x8xbf16>, vector<8x8xbf16>, vector<128x8xf32> -> vector<128x8xf32>
    %c0_8 = arith.constant 0 : index
    %c0_9 = arith.constant 0 : index
    %8 = vector.load %arg4[%c0_8, %c0_9] : memref<128x1xf32, #tpu.memory_space<vmem>>, vector<128x1xf32>
    %9 = vector.broadcast %8 : vector<128x1xf32> to vector<128x8xf32>
    %10 = arith.addf %5, %9 : vector<128x8xf32>
    %cst_10 = arith.constant 0.000000e+00 : f32
    %11 = vector.broadcast %cst_10 : f32 to vector<128x8xf32>
    %12 = arith.cmpf ogt, %10, %11 : vector<128x8xf32>
    %cst_11 = arith.constant 2.000000e-01 : f32
    %13 = vector.broadcast %cst_11 : f32 to vector<128x8xf32>
    %14 = arith.mulf %13, %10 : vector<128x8xf32>
    %15 = arith.select %12, %10, %14 : vector<128x8xi1>, vector<128x8xf32>
    %c0_12 = arith.constant 0 : index
    %c0_13 = arith.constant 0 : index
    %16 = vector.load %arg6[%c0_12, %c0_13] : memref<128x1xf32, #tpu.memory_space<vmem>>, vector<128x1xf32>
    %17 = vector.broadcast %16 : vector<128x1xf32> to vector<128x8xf32>
    %18 = arith.addf %7, %17 : vector<128x8xf32>
    %cst_14 = arith.constant 0.000000e+00 : f32
    %19 = vector.broadcast %cst_14 : f32 to vector<128x8xf32>
    %20 = arith.cmpf ogt, %18, %19 : vector<128x8xf32>
    %cst_15 = arith.constant 2.000000e-01 : f32
    %21 = vector.broadcast %cst_15 : f32 to vector<128x8xf32>
    %22 = arith.mulf %21, %18 : vector<128x8xf32>
    %23 = arith.select %20, %18, %22 : vector<128x8xi1>, vector<128x8xf32>
    %24 = tpu.concatenate %15, %23 in 0 : vector<128x8xf32>, vector<128x8xf32> -> vector<256x8xf32>
    %25 = arith.truncf %24 : vector<256x8xf32> to vector<256x8xbf16>
    %c0_16 = arith.constant 0 : index
    %c0_17 = arith.constant 0 : index
    %26 = vector.load %arg7[%c0_16, %c0_17] : memref<128x256xbf16, #tpu.memory_space<vmem>>, vector<128x256xbf16>
    %cst_18 = arith.constant dense<0.000000e+00> : vector<128x8xf32>
    %27 = tpu.matmul %26, %25, %cst_18 {dimension_numbers = #tpu.dot_dimension_numbers<[1], [0], [0], [1], [0, 0, 1, 1], [], []>} : vector<128x256xbf16>, vector<256x8xbf16>, vector<128x8xf32> -> vector<128x8xf32>
    %c0_19 = arith.constant 0 : index
    %c0_20 = arith.constant 0 : index
    %28 = vector.load %arg8[%c0_19, %c0_20] : memref<128x1xf32, #tpu.memory_space<vmem>>, vector<128x1xf32>
    %29 = vector.broadcast %28 : vector<128x1xf32> to vector<128x8xf32>
    %30 = arith.addf %27, %29 : vector<128x8xf32>
    %cst_21 = arith.constant 0.000000e+00 : f32
    %31 = vector.broadcast %cst_21 : f32 to vector<128x8xf32>
    %32 = arith.cmpf ogt, %30, %31 : vector<128x8xf32>
    %cst_22 = arith.constant 2.000000e-01 : f32
    %33 = vector.broadcast %cst_22 : f32 to vector<128x8xf32>
    %34 = arith.mulf %33, %30 : vector<128x8xf32>
    %35 = arith.select %32, %30, %34 : vector<128x8xi1>, vector<128x8xf32>
    %c0_23 = arith.constant 0 : index
    %c0_24 = arith.constant 0 : index
    %36 = vector.load %arg9[%c0_23, %c0_24] : memref<128x1xf32, #tpu.memory_space<vmem>>, vector<128x1xf32>
    %37 = vector.broadcast %36 : vector<128x1xf32> to vector<128x8xf32>
    %38 = arith.mulf %35, %37 : vector<128x8xf32>
    %cst_25 = arith.constant dense<0.000000e+00> : vector<8xf32>
    %39 = vector.multi_reduction <add>, %38, %cst_25 [0] : vector<128x8xf32> to vector<8xf32>
    %40 = vector.shape_cast %39 : vector<8xf32> to vector<1x8xf32>
    %c0_26 = arith.constant 0 : index
    %41 = memref.load %arg10[%c0_26] : memref<1xf32, #tpu.memory_space<smem>>
    %42 = vector.broadcast %41 : f32 to vector<1x8xf32>
    %43 = arith.addf %40, %42 : vector<1x8xf32>
    %44 = arith.negf %43 : vector<1x8xf32>
    %45 = math.exp %44 : vector<1x8xf32>
    %cst_27 = arith.constant 1.000000e+00 : f32
    %46 = vector.broadcast %cst_27 : f32 to vector<1x8xf32>
    %47 = arith.addf %46, %45 : vector<1x8xf32>
    %48 = arith.divf %46, %47 : vector<1x8xf32>
    %49 = vector.shape_cast %48 : vector<1x8xf32> to vector<1x1x8xf32>
    %c0_28 = arith.constant 0 : index
    %c0_29 = arith.constant 0 : index
    %c0_30 = arith.constant 0 : index
    %50 = vector.load %arg11[%c0_28, %c0_29, %c0_30] : memref<1x1x8xf32, #tpu.memory_space<vmem>>, vector<1x1x8xf32>
    tpu.vector_store %arg11[%c0_28, %c0_29, %c0_30], %49 {strides = array<i32>} : memref<1x1x8xf32, #tpu.memory_space<vmem>>, vector<1x1x8xf32>,
    return
  }
  func.func @transform_0(%arg0: i32) -> (i32, i32) {
    %c0_i32 = arith.constant 0 : i32
    %c0_i32_0 = arith.constant 0 : i32
    return %arg0, %c0_i32 : i32, i32
  }
  func.func @transform_1(%arg0: i32) -> (i32, i32) {
    %c0_i32 = arith.constant 0 : i32
    %c0_i32_0 = arith.constant 0 : i32
    return %arg0, %c0_i32 : i32, i32
  }
  func.func @transform_2(%arg0: i32) -> (i32, i32) {
    %c0_i32 = arith.constant 0 : i32
    %c0_i32_0 = arith.constant 0 : i32
    %c0_i32_1 = arith.constant 0 : i32
    return %c0_i32, %c0_i32_0 : i32, i32
  }
  func.func @transform_3(%arg0: i32) -> (i32, i32) {
    %c0_i32 = arith.constant 0 : i32
    %c0_i32_0 = arith.constant 0 : i32
    %c0_i32_1 = arith.constant 0 : i32
    return %c0_i32, %c0_i32_0 : i32, i32
  }
  func.func @transform_4(%arg0: i32) -> (i32, i32) {
    %c0_i32 = arith.constant 0 : i32
    %c0_i32_0 = arith.constant 0 : i32
    %c0_i32_1 = arith.constant 0 : i32
    return %c0_i32, %c0_i32_0 : i32, i32
  }
  func.func @transform_5(%arg0: i32) -> (i32, i32) {
    %c0_i32 = arith.constant 0 : i32
    %c0_i32_0 = arith.constant 0 : i32
    %c0_i32_1 = arith.constant 0 : i32
    return %c0_i32, %c0_i32_0 : i32, i32
  }
  func.func @transform_6(%arg0: i32) -> (i32, i32) {
    %c0_i32 = arith.constant 0 : i32
    %c0_i32_0 = arith.constant 0 : i32
    %c0_i32_1 = arith.constant 0 : i32
    return %c0_i32, %c0_i32_0 : i32, i32
  }
  func.func @transform_7(%arg0: i32) -> (i32, i32) {
    %c0_i32 = arith.constant 0 : i32
    %c0_i32_0 = arith.constant 0 : i32
    %c0_i32_1 = arith.constant 0 : i32
    return %c0_i32, %c0_i32_0 : i32, i32
  }
  func.func @transform_8(%arg0: i32) -> (i32, i32) {
    %c0_i32 = arith.constant 0 : i32
    %c0_i32_0 = arith.constant 0 : i32
    %c0_i32_1 = arith.constant 0 : i32
    return %c0_i32, %c0_i32_0 : i32, i32
  }
  func.func @transform_9(%arg0: i32) -> i32 {
    %c0_i32 = arith.constant 0 : i32
    %c0_i32_0 = arith.constant 0 : i32
    return %c0_i32 : i32
  }
  func.func @transform_10(%arg0: i32) -> (i32, i32, i32) {
    %c0_i32 = arith.constant 0 : i32
    %c0_i32_0 = arith.constant 0 : i32
    %c0_i32_1 = arith.constant 0 : i32
    return %arg0, %c0_i32, %c0_i32_0 : i32, i32, i32
  }
}

module attributes {stable_mosaic.version = 11 : i64} {
  func.func @cgan_disc_kernel(%arg0: i32, %arg1: memref<8x16xf32, #tpu.memory_space<vmem>>, %arg2: memref<8x8xf32, #tpu.memory_space<vmem>>, %arg3: memref<128x16xbf16, #tpu.memory_space<vmem>>, %arg4: memref<128x1xf32, #tpu.memory_space<vmem>>, %arg5: memref<128x8xbf16, #tpu.memory_space<vmem>>, %arg6: memref<128x1xf32, #tpu.memory_space<vmem>>, %arg7: memref<128x256xbf16, #tpu.memory_space<vmem>>, %arg8: memref<128x1xf32, #tpu.memory_space<vmem>>, %arg9: memref<128x1xf32, #tpu.memory_space<vmem>>, %arg10: memref<1xf32, #tpu.memory_space<smem>>, %arg11: memref<1x1x8xf32, #tpu.memory_space<vmem>>) attributes {dimension_semantics = [#tpu.dimension_semantics<parallel>], iteration_bounds = array<i64: 1>, scalar_prefetch = 0 : i64, scratch_operands = 0 : i64, tpu.core_type = #tpu.core_type<tc>, window_params = [{transform_indices = @transform_0, window_bounds = array<i64: 8, 16>}, {transform_indices = @transform_1, window_bounds = array<i64: 8, 8>}, {pipeline_mode = #tpu.pipeline_mode<synchronous>, transform_indices = @transform_2, window_bounds = array<i64: 128, 16>}, {pipeline_mode = #tpu.pipeline_mode<synchronous>, transform_indices = @transform_3, window_bounds = array<i64: 128, 1>}, {pipeline_mode = #tpu.pipeline_mode<synchronous>, transform_indices = @transform_4, window_bounds = array<i64: 128, 8>}, {pipeline_mode = #tpu.pipeline_mode<synchronous>, transform_indices = @transform_5, window_bounds = array<i64: 128, 1>}, {pipeline_mode = #tpu.pipeline_mode<synchronous>, transform_indices = @transform_6, window_bounds = array<i64: 128, 256>}, {pipeline_mode = #tpu.pipeline_mode<synchronous>, transform_indices = @transform_7, window_bounds = array<i64: 128, 1>}, {pipeline_mode = #tpu.pipeline_mode<synchronous>, transform_indices = @transform_8, window_bounds = array<i64: 128, 1>}, {transform_indices = @transform_9, window_bounds = array<i64: 1>}, {transform_indices = @transform_10, window_bounds = array<i64: 1, 1, 8>}]} {
    %c0 = arith.constant 0 : index
    %c0_0 = arith.constant 0 : index
    %0 = vector.load %arg1[%c0, %c0_0] : memref<8x16xf32, #tpu.memory_space<vmem>>, vector<8x16xf32>
    %1 = arith.truncf %0 : vector<8x16xf32> to vector<8x16xbf16>
    %c0_1 = arith.constant 0 : index
    %c0_2 = arith.constant 0 : index
    %2 = vector.load %arg2[%c0_1, %c0_2] : memref<8x8xf32, #tpu.memory_space<vmem>>, vector<8x8xf32>
    %3 = arith.truncf %2 : vector<8x8xf32> to vector<8x8xbf16>
    %c0_3 = arith.constant 0 : index
    %c0_4 = arith.constant 0 : index
    %4 = vector.load %arg3[%c0_3, %c0_4] : memref<128x16xbf16, #tpu.memory_space<vmem>>, vector<128x16xbf16>
    %cst = arith.constant dense<0.000000e+00> : vector<128x8xf32>
    %5 = tpu.matmul %4, %1, %cst {dimension_numbers = #tpu.dot_dimension_numbers<[1], [1], [0], [0], [0, 0, 1, 0], [], []>} : vector<128x16xbf16>, vector<8x16xbf16>, vector<128x8xf32> -> vector<128x8xf32>
    %c0_5 = arith.constant 0 : index
    %c0_6 = arith.constant 0 : index
    %6 = vector.load %arg5[%c0_5, %c0_6] : memref<128x8xbf16, #tpu.memory_space<vmem>>, vector<128x8xbf16>
    %cst_7 = arith.constant dense<0.000000e+00> : vector<128x8xf32>
    %7 = tpu.matmul %6, %3, %cst_7 {dimension_numbers = #tpu.dot_dimension_numbers<[1], [1], [0], [0], [0, 0, 1, 0], [], []>} : vector<128x8xbf16>, vector<8x8xbf16>, vector<128x8xf32> -> vector<128x8xf32>
    %c0_8 = arith.constant 0 : index
    %c0_9 = arith.constant 0 : index
    %8 = vector.load %arg4[%c0_8, %c0_9] : memref<128x1xf32, #tpu.memory_space<vmem>>, vector<128x1xf32>
    %9 = vector.broadcast %8 : vector<128x1xf32> to vector<128x8xf32>
    %10 = arith.addf %5, %9 : vector<128x8xf32>
    %cst_10 = arith.constant 0.000000e+00 : f32
    %11 = vector.broadcast %cst_10 : f32 to vector<128x8xf32>
    %12 = arith.cmpf ogt, %10, %11 : vector<128x8xf32>
    %cst_11 = arith.constant 2.000000e-01 : f32
    %13 = vector.broadcast %cst_11 : f32 to vector<128x8xf32>
    %14 = arith.mulf %13, %10 : vector<128x8xf32>
    %15 = arith.select %12, %10, %14 : vector<128x8xi1>, vector<128x8xf32>
    %c0_12 = arith.constant 0 : index
    %c0_13 = arith.constant 0 : index
    %16 = vector.load %arg6[%c0_12, %c0_13] : memref<128x1xf32, #tpu.memory_space<vmem>>, vector<128x1xf32>
    %17 = vector.broadcast %16 : vector<128x1xf32> to vector<128x8xf32>
    %18 = arith.addf %7, %17 : vector<128x8xf32>
    %cst_14 = arith.constant 0.000000e+00 : f32
    %19 = vector.broadcast %cst_14 : f32 to vector<128x8xf32>
    %20 = arith.cmpf ogt, %18, %19 : vector<128x8xf32>
    %cst_15 = arith.constant 2.000000e-01 : f32
    %21 = vector.broadcast %cst_15 : f32 to vector<128x8xf32>
    %22 = arith.mulf %21, %18 : vector<128x8xf32>
    %23 = arith.select %20, %18, %22 : vector<128x8xi1>, vector<128x8xf32>
    %24 = tpu.concatenate %15, %23 in 0 : vector<128x8xf32>, vector<128x8xf32> -> vector<256x8xf32>
    %25 = arith.truncf %24 : vector<256x8xf32> to vector<256x8xbf16>
    %c0_16 = arith.constant 0 : index
    %c0_17 = arith.constant 0 : index
    %26 = vector.load %arg7[%c0_16, %c0_17] : memref<128x256xbf16, #tpu.memory_space<vmem>>, vector<128x256xbf16>
    %cst_18 = arith.constant dense<0.000000e+00> : vector<128x8xf32>
    %27 = tpu.matmul %26, %25, %cst_18 {dimension_numbers = #tpu.dot_dimension_numbers<[1], [0], [0], [1], [0, 0, 1, 1], [], []>} : vector<128x256xbf16>, vector<256x8xbf16>, vector<128x8xf32> -> vector<128x8xf32>
    %c0_19 = arith.constant 0 : index
    %c0_20 = arith.constant 0 : index
    %28 = vector.load %arg8[%c0_19, %c0_20] : memref<128x1xf32, #tpu.memory_space<vmem>>, vector<128x1xf32>
    %29 = vector.broadcast %28 : vector<128x1xf32> to vector<128x8xf32>
    %30 = arith.addf %27, %29 : vector<128x8xf32>
    %cst_21 = arith.constant 0.000000e+00 : f32
    %31 = vector.broadcast %cst_21 : f32 to vector<128x8xf32>
    %32 = arith.cmpf ogt, %30, %31 : vector<128x8xf32>
    %cst_22 = arith.constant 2.000000e-01 : f32
    %33 = vector.broadcast %cst_22 : f32 to vector<128x8xf32>
    %34 = arith.mulf %33, %30 : vector<128x8xf32>
    %35 = arith.select %32, %30, %34 : vector<128x8xi1>, vector<128x8xf32>
    %c0_23 = arith.constant 0 : index
    %c0_24 = arith.constant 0 : index
    %36 = vector.load %arg9[%c0_23, %c0_24] : memref<128x1xf32, #tpu.memory_space<vmem>>, vector<128x1xf32>
    %37 = vector.broadcast %36 : vector<128x1xf32> to vector<128x8xf32>
    %38 = arith.mulf %35, %37 : vector<128x8xf32>
    %cst_25 = arith.constant dense<0.000000e+00> : vector<8xf32>
    %39 = vector.multi_reduction <add>, %38, %cst_25 [0] : vector<128x8xf32> to vector<8xf32>
    %40 = vector.shape_cast %39 : vector<8xf32> to vector<1x8xf32>
    %c0_26 = arith.constant 0 : index
    %41 = memref.load %arg10[%c0_26] : memref<1xf32, #tpu.memory_space<smem>>
    %42 = vector.broadcast %41 : f32 to vector<1x8xf32>
    %43 = arith.addf %40, %42 : vector<1x8xf32>
    %44 = arith.negf %43 : vector<1x8xf32>
    %45 = math.exp %44 : vector<1x8xf32>
    %cst_27 = arith.constant 1.000000e+00 : f32
    %46 = vector.broadcast %cst_27 : f32 to vector<1x8xf32>
    %47 = arith.addf %46, %45 : vector<1x8xf32>
    %48 = arith.divf %46, %47 : vector<1x8xf32>
    %49 = vector.shape_cast %48 : vector<1x8xf32> to vector<1x1x8xf32>
    %c0_28 = arith.constant 0 : index
    %c0_29 = arith.constant 0 : index
    %c0_30 = arith.constant 0 : index
    %50 = vector.load %arg11[%c0_28, %c0_29, %c0_30] : memref<1x1x8xf32, #tpu.memory_space<vmem>>, vector<1x1x8xf32>
    tpu.vector_store %arg11[%c0_28, %c0_29, %c0_30], %49 {strides = array<i32>} : memref<1x1x8xf32, #tpu.memory_space<vmem>>, vector<1x1x8xf32>,
    return
  }
  func.func @transform_0(%arg0: i32) -> (i32, i32) {
    %c0_i32 = arith.constant 0 : i32
    %c0_i32_0 = arith.constant 0 : i32
    return %arg0, %c0_i32 : i32, i32
  }
  func.func @transform_1(%arg0: i32) -> (i32, i32) {
    %c0_i32 = arith.constant 0 : i32
    %c0_i32_0 = arith.constant 0 : i32
    return %arg0, %c0_i32 : i32, i32
  }
  func.func @transform_2(%arg0: i32) -> (i32, i32) {
    %c0_i32 = arith.constant 0 : i32
    %c0_i32_0 = arith.constant 0 : i32
    %c0_i32_1 = arith.constant 0 : i32
    return %c0_i32, %c0_i32_0 : i32, i32
  }
  func.func @transform_3(%arg0: i32) -> (i32, i32) {
    %c0_i32 = arith.constant 0 : i32
    %c0_i32_0 = arith.constant 0 : i32
    %c0_i32_1 = arith.constant 0 : i32
    return %c0_i32, %c0_i32_0 : i32, i32
  }
  func.func @transform_4(%arg0: i32) -> (i32, i32) {
    %c0_i32 = arith.constant 0 : i32
    %c0_i32_0 = arith.constant 0 : i32
    %c0_i32_1 = arith.constant 0 : i32
    return %c0_i32, %c0_i32_0 : i32, i32
  }
  func.func @transform_5(%arg0: i32) -> (i32, i32) {
    %c0_i32 = arith.constant 0 : i32
    %c0_i32_0 = arith.constant 0 : i32
    %c0_i32_1 = arith.constant 0 : i32
    return %c0_i32, %c0_i32_0 : i32, i32
  }
  func.func @transform_6(%arg0: i32) -> (i32, i32) {
    %c0_i32 = arith.constant 0 : i32
    %c0_i32_0 = arith.constant 0 : i32
    %c0_i32_1 = arith.constant 0 : i32
    return %c0_i32, %c0_i32_0 : i32, i32
  }
  func.func @transform_7(%arg0: i32) -> (i32, i32) {
    %c0_i32 = arith.constant 0 : i32
    %c0_i32_0 = arith.constant 0 : i32
    %c0_i32_1 = arith.constant 0 : i32
    return %c0_i32, %c0_i32_0 : i32, i32
  }
  func.func @transform_8(%arg0: i32) -> (i32, i32) {
    %c0_i32 = arith.constant 0 : i32
    %c0_i32_0 = arith.constant 0 : i32
    %c0_i32_1 = arith.constant 0 : i32
    return %c0_i32, %c0_i32_0 : i32, i32
  }
  func.func @transform_9(%arg0: i32) -> i32 {
    %c0_i32 = arith.constant 0 : i32
    %c0_i32_0 = arith.constant 0 : i32
    return %c0_i32 : i32
  }
  func.func @transform_10(%arg0: i32) -> (i32, i32, i32) {
    %c0_i32 = arith.constant 0 : i32
    %c0_i32_0 = arith.constant 0 : i32
    %c0_i32_1 = arith.constant 0 : i32
    return %arg0, %c0_i32, %c0_i32_0 : i32, i32, i32
  }
}

</mosaic_0001>

<bundles_post_ra>
// kernel: tpu_custom_call.1
= control target key start
LH: loop header
LB: loop body
LE: loop exit
PB: predicated region body
PF: predicated region fallthrough
CT: control target
= control target key end

     0   :  { %vm210_vm0 = vcmask 130048   ;;  %v1474_v3 = vmov 0   ;;  %vm519_vm1 = vcmask 64512   ;;  %s2078_s0 = inlined_call_operand.vmem [shape: f32[8,16], index: 0, kind: input, shape index: {}]   ;;  %s2079_s1 = inlined_call_operand.vmem [shape: f32[8,8], index: 1, kind: input, shape index: {}]   ;;  %s2080_s2 = inlined_call_operand.vmem [shape: bf16[128,16], index: 2, kind: input, shape index: {}]   ;;  %s2081_s3 = inlined_call_operand.vmem [shape: f32[128,1], index: 3, kind: input, shape index: {}]   ;;  %s2082_s4 = inlined_call_operand.vmem [shape: bf16[128,8], index: 4, kind: input, shape index: {}]   ;;  %s2083_s5 = inlined_call_operand.vmem [shape: f32[128,1], index: 5, kind: input, shape index: {}]   ;;  %s2084_s6 = inlined_call_operand.vmem [shape: bf16[128,256], index: 6, kind: input, shape index: {}]   ;;  %s2085_s7 = inlined_call_operand.vmem [shape: f32[128,1], index: 7, kind: input, shape index: {}]   ;;  %s2086_s8 = inlined_call_operand.vmem [shape: f32[128,1], index: 8, kind: input, shape index: {}]   ;;  %s2087_s9 = inlined_call_operand.<no memory space> [shape: f32[1], index: 9, kind: input, shape index: {}]   ;;  %s2088_s10 = inlined_call_operand.hbm [shape: f32[1,1,8], index: 10, kind: output, shape index: {}]  }
   0x1   :  { %v397_v0 = vld [vmem:[%s2083_s5 + $0x70] sm:$0xff]  ;;  %v38_v2 = vld [vmem:[%s2078_s0] sm:$0xff]  ;;  %1407 = vset.pattern.permute.xlu1 %v1474_v3  ;;  %1406 = vset.pattern.permute.xlu0 %v1474_v3  ;;  %v398_v7 = vld [vmem:[%s2083_s5 + $0x78] sm:$0xff] }
   0x2   :  { %v88_v1 = vld [vmem:[%s2081_s3 + $0x70] sm:$0xff]  ;;  %v39_v4 = vpack.c.bf16 %v38_v2, %v38_v2  ;;  %v40_v5 = vld [vmem:[%s2079_s1] sm:$0xff]  ;;  %471 = vperm.xlu0 %1406, %v397_v0   ;;  %v89_v8 = vld [vmem:[%s2081_s3 + $0x78] sm:$0xff] }
   0x3   :  { %162 = vperm.xlu1 %1407, %v88_v1   ;;  %v41_v6 = vpack.c.bf16 %v40_v5, %v40_v5  ;;  %v1408_v10 = vld [vmem:[%s2080_s2] sm:$0xff]   ;;  %v396_v14 = vld [vmem:[%s2083_s5 + $0x68] sm:$0xff]  ;;  %v1412_v17 = vld [vmem:[%s2080_s2 + $0x10] sm:$0xff]  }
   0x4   :  { %1402 = vmatprep.subr.msk.bf16.mxu0 %vm210_vm0, %v39_v4  ;;  %v236_v9 = vsel %vm210_vm0, %v39_v4, 0  ;;  %v1409_v12 = vld [vmem:[%s2082_s4] sm:$0xff]   ;;  %1352 = vmatprep.mubr.msk.bf16.mxu0 %vm210_vm0, %v1408_v10  ;;  %v1410_v15 = vld [vmem:[%s2080_s2 + $0x8] sm:$0xff]   ;;  %v1413_v18 = vld [vmem:[%s2082_s4 + $0x10] sm:$0xff]  }
   0x5   :  { %1403 = vmatprep.subr.msk.bf16.mxu1 %vm519_vm1, %v41_v6  ;;  %1351 = vmatpush3.bf16.xpose.msra.mxu0 %v236_v9  ;;  %v545_v11 = vsel %vm519_vm1, %v41_v6, 0  ;;  %v395_v13 = vld [vmem:[%s2083_s5 + $0x60] sm:$0xff]  ;;  %v1411_v16 = vld [vmem:[%s2082_s4 + $0x8] sm:$0xff]   ;;  %v394_v21 = vld [vmem:[%s2083_s5 + $0x58] sm:$0xff] }
   0x6   :  { %1369 = vmatpush3.bf16.xpose.msra.mxu1 %v545_v11  ;;  %476 = vperm.xlu0 %1406, %v398_v7   ;;  %v87_v19 = vld [vmem:[%s2081_s3 + $0x68] sm:$0xff]  ;;  %v86_v20 = vld [vmem:[%s2081_s3 + $0x60] sm:$0xff]  ;;  %v393_v22 = vld [vmem:[%s2083_s5 + $0x50] sm:$0xff] }
   0x7   :  { %167 = vperm.xlu1 %1407, %v89_v8   ;;  %1370 = vmatprep.mubr.msk.bf16.mxu1 %vm519_vm1, %v1409_v12  ;;  %v1414_v23 = vld [vmem:[%s2080_s2 + $0x18] sm:$0xff]   ;;  %v1416_v25 = vld [vmem:[%s2080_s2 + $0x20] sm:$0xff]   ;;  %v84_v28 = vld [vmem:[%s2081_s3 + $0x50] sm:$0xff] }
   0x8   :  { %v1415_v24 = vld [vmem:[%s2082_s4 + $0x18] sm:$0xff]   ;;  %v1417_v26 = vld [vmem:[%s2082_s4 + $0x20] sm:$0xff]   ;;  %v392_v29 = vld [vmem:[%s2083_s5 + $0x48] sm:$0xff] }
   0x9   :  { %v85_v27 = vld [vmem:[%s2081_s3 + $0x58] sm:$0xff]  ;;  %v391_v30 = vld [vmem:[%s2083_s5 + $0x40] sm:$0xff]  ;;  %v1418_v31 = vld [vmem:[%s2080_s2 + $0x28] sm:$0xff]  }
   0xa   :  { %461 = vperm.xlu0 %1406, %v395_v13   ;;  %v1419_v32 = vld [vmem:[%s2082_s4 + $0x28] sm:$0xff]   ;;  %v1420_v33 = vld [vmem:[%s2080_s2 + $0x30] sm:$0xff]   ;;  %v82_v36 = vld [vmem:[%s2081_s3 + $0x40] sm:$0xff] }
   0xb   :  { %466 = vperm.xlu1 %1407, %v396_v14   ;;  %v1421_v34 = vld [vmem:[%s2082_s4 + $0x30] sm:$0xff]   ;;  %v83_v35 = vld [vmem:[%s2081_s3 + $0x48] sm:$0xff]  ;;  %v390_v37 = vld [vmem:[%s2083_s5 + $0x38] sm:$0xff] }
   0xc   :  { %1353 = vmatmul.mubr.msk.bf16.vlgmr.msra.gmra.mxu0 %vm210_vm0, %v1410_v15  ;;  %v389_v38 = vld [vmem:[%s2083_s5 + $0x30] sm:$0xff]  ;;  %v1422_v39 = vld [vmem:[%s2080_s2 + $0x38] sm:$0xff]   ;;  %v388_v43 = vld [vmem:[%s2083_s5 + $0x28] sm:$0xff] }
   0xd   :  { %1371 = vmatmul.mubr.msk.bf16.vlgmr.msra.gmra.mxu1 %vm519_vm1, %v1411_v16  ;;  %1356 = vmatprep.mubr.msk.bf16.mxu0 %vm210_vm0, %v1412_v17  ;;  %v1423_v40 = vld [vmem:[%s2082_s4 + $0x38] sm:$0xff]   ;;  %v80_v42 = vld [vmem:[%s2081_s3 + $0x30] sm:$0xff]  ;;  %v387_v44 = vld [vmem:[%s2083_s5 + $0x20] sm:$0xff] }
   0xe   :  { %1374 = vmatprep.mubr.msk.bf16.mxu1 %vm519_vm1, %v1413_v18  ;;  %152 = vperm.xlu0 %1406, %v86_v20   ;;  %v81_v41 = vld [vmem:[%s2081_s3 + $0x38] sm:$0xff]  ;;  %v79_v45 = vld [vmem:[%s2081_s3 + $0x28] sm:$0xff]  ;;  %v78_v46 = vld [vmem:[%s2081_s3 + $0x20] sm:$0xff] }
   0xf   :  { %157 = vperm.xlu1 %1407, %v87_v19  }
  0x12   :  { %451 = vperm.xlu0 %1406, %v393_v22  }
  0x13   :  { %456 = vperm.xlu1 %1407, %v394_v21  }
  0x14   :  { %1357 = vmatmul.mubr.msk.bf16.gmra.mxu0 %vm210_vm0, %v1414_v23 }
  0x15   :  { %1375 = vmatmul.mubr.msk.bf16.gmra.mxu1 %vm519_vm1, %v1415_v24  ;;  %1360 = vmatprep.mubr.msk.bf16.mxu0 %vm210_vm0, %v1416_v25 }
  0x16   :  { %1378 = vmatprep.mubr.msk.bf16.mxu1 %vm519_vm1, %v1417_v26  ;;  %142 = vperm.xlu0 %1406, %v84_v28  }
  0x17   :  { %147 = vperm.xlu1 %1407, %v85_v27  }
  0x1a   :  { %441 = vperm.xlu0 %1406, %v391_v30  }
  0x1b   :  { %446 = vperm.xlu1 %1407, %v392_v29  }
  0x1c   :  { %1361 = vmatmul.mubr.msk.bf16.gmra.mxu0 %vm210_vm0, %v1418_v31 }
  0x1d   :  { %1379 = vmatmul.mubr.msk.bf16.gmra.mxu1 %vm519_vm1, %v1419_v32  ;;  %1364 = vmatprep.mubr.msk.bf16.mxu0 %vm210_vm0, %v1420_v33 }
  0x1e   :  { %1382 = vmatprep.mubr.msk.bf16.mxu1 %vm519_vm1, %v1421_v34  ;;  %132 = vperm.xlu0 %1406, %v82_v36  }
  0x1f   :  { %137 = vperm.xlu1 %1407, %v83_v35  }
  0x22   :  { %431 = vperm.xlu0 %1406, %v389_v38  }
  0x23   :  { %436 = vperm.xlu1 %1407, %v390_v37  }
  0x24   :  { %1365 = vmatmul.mubr.msk.bf16.gmra.mxu0 %vm210_vm0, %v1422_v39 }
  0x25   :  { %1383 = vmatmul.mubr.msk.bf16.gmra.mxu1 %vm519_vm1, %v1423_v40 }
  0x26   :  { %122 = vperm.xlu0 %1406, %v80_v42  }
  0x27   :  { %127 = vperm.xlu1 %1407, %v81_v41  }
  0x2a   :  { %421 = vperm.xlu0 %1406, %v387_v44  }
  0x2b   :  { %426 = vperm.xlu1 %1407, %v388_v43  }
  0x2c   :  { %16 = vsyncpa [#allocation4], 0  ;;  %v386_v47 = vld [vmem:[%s2083_s5 + $0x18] sm:$0xff]  ;;  %v385_v48 = vld [vmem:[%s2083_s5 + $0x10] sm:$0xff] }
  0x2d   :  { %v77_v49 = vld [vmem:[%s2081_s3 + $0x18] sm:$0xff]  ;;  %v76_v50 = vld [vmem:[%s2081_s3 + $0x10] sm:$0xff]  ;;  %v384_v51 = vld [vmem:[%s2083_s5 + $0x8] sm:$0xff] }
  0x2e   :  { %112 = vperm.xlu0 %1406, %v78_v46   ;;  %v383_v52 = vld [vmem:[%s2083_s5] sm:$0xff]  ;;  %v75_v53 = vld [vmem:[%s2081_s3 + $0x8] sm:$0xff]  ;;  %v727_v57 = vld [vmem:[%s2085_s7 + $0x18] sm:$0xff] }
  0x2f   :  { %117 = vperm.xlu1 %1407, %v79_v45   ;;  %v74_v54 = vld [vmem:[%s2081_s3] sm:$0xff]  ;;  %v725_v55 = vld [vmem:[%s2085_s7 + $0x8] sm:$0xff]  ;;  %v726_v58 = vld [vmem:[%s2085_s7 + $0x10] sm:$0xff] }
  0x30   :  { %v724_v56 = vld [vmem:[%s2085_s7] sm:$0xff]  ;;  %v1046_v59 = vld [vmem:[%s2086_s8 + $0x8] sm:$0xff]  ;;  %v1047_v61 = vld [vmem:[%s2086_s8 + $0x10] sm:$0xff] }
  0x31   :  { %v1045_v60 = vld [vmem:[%s2086_s8] sm:$0xff]  ;;  %v1048_v63 = vld [vmem:[%s2086_s8 + $0x18] sm:$0xff]  ;;  %v729_v0 = vld [vmem:[%s2085_s7 + $0x28] sm:$0xff] }
  0x32   :  { %411 = vperm.xlu0 %1406, %v385_v48   ;;  %v728_v62 = vld [vmem:[%s2085_s7 + $0x20] sm:$0xff]  ;;  %v730_v2 = vld [vmem:[%s2085_s7 + $0x30] sm:$0xff]  ;;  %v1050_v3 = vld [vmem:[%s2086_s8 + $0x28] sm:$0xff] }
  0x33   :  { %416 = vperm.xlu1 %1407, %v386_v47   ;;  %v1049_v1 = vld [vmem:[%s2086_s8 + $0x20] sm:$0xff]  ;;  %v731_v4 = vld [vmem:[%s2085_s7 + $0x38] sm:$0xff]  ;;  %v1051_v5 = vld [vmem:[%s2086_s8 + $0x30] sm:$0xff] }
  0x34   :  { %v732_v6 = vld [vmem:[%s2085_s7 + $0x40] sm:$0xff]  ;;  %v1052_v7 = vld [vmem:[%s2086_s8 + $0x38] sm:$0xff]  ;;  %v733_v8 = vld [vmem:[%s2085_s7 + $0x48] sm:$0xff] }
  0x35   :  { %v1053_v9 = vld [vmem:[%s2086_s8 + $0x40] sm:$0xff]  ;;  %v734_v10 = vld [vmem:[%s2085_s7 + $0x50] sm:$0xff]  ;;  %v1054_v11 = vld [vmem:[%s2086_s8 + $0x48] sm:$0xff] }
  0x36   :  { %102 = vperm.xlu0 %1406, %v76_v50   ;;  %v735_v12 = vld [vmem:[%s2085_s7 + $0x58] sm:$0xff]  ;;  %v1055_v13 = vld [vmem:[%s2086_s8 + $0x50] sm:$0xff]  ;;  %v736_v14 = vld [vmem:[%s2085_s7 + $0x60] sm:$0xff] }
  0x37   :  { %107 = vperm.xlu1 %1407, %v77_v49   ;;  %v1056_v15 = vld [vmem:[%s2086_s8 + $0x58] sm:$0xff]  ;;  %v737_v16 = vld [vmem:[%s2085_s7 + $0x68] sm:$0xff]  ;;  %v1057_v17 = vld [vmem:[%s2086_s8 + $0x60] sm:$0xff] }
  0x38   :  { %v738_v18 = vld [vmem:[%s2085_s7 + $0x70] sm:$0xff]  ;;  %v1058_v19 = vld [vmem:[%s2086_s8 + $0x68] sm:$0xff]  ;;  %v739_v20 = vld [vmem:[%s2085_s7 + $0x78] sm:$0xff] }
  0x39   :  { %v1060_v21 = vld [vmem:[%s2086_s8 + $0x78] sm:$0xff]  ;;  %v1059_v22 = vld [vmem:[%s2086_s8 + $0x70] sm:$0xff]  ;;  %v1426_v23 = vld [vmem:[%s2084_s6 + $0x4] ss:$8 sps:$4 sm:$0xff]   ;;  %s1475_s8 = smov [#allocation3]  }
  0x3a   :  { %401 = vperm.xlu0 %1406, %v383_v52   ;;  %v1429_v24 = vld [vmem:[%s2084_s6 + $0x44] ss:$8 sps:$4 sm:$0xff]   ;;  %932 = vmatprep.mubr.bf16.mxu0 %v1426_v23  ;;  %s1211_s13 = sshll.u32 %s1475_s8, 4  ;;  %s1212_s13 = int_to_ptr.vmem [resolvable:$true] %s1211_s13 }
  0x3b   :  { %406 = vperm.xlu1 %1407, %v384_v51   ;;  %964 = vmatprep.mubr.bf16.mxu1 %v1429_v24  ;;  %s1452_s14 = scalar_lea.vmem %s1212_s13, 16  ;;  %s1456_s15 = scalar_lea.vmem %s1212_s13, 32 }
  0x3c   :  { %p1453_p0 = scmp.ne.s32.totalorder %s1212_s13, %s1452_s14  ;;  %p1457_p1 = scmp.lt.s32.totalorder %s1212_s13, %s1212_s13 }
  0x3d   :  { %p1458_p2 = scmp.lt.s32.totalorder %s1456_s15, %s1452_s14 }
  0x3e   :  { %92 = vperm.xlu0 %1406, %v74_v54  }
  0x3f   :  { %97 = vperm.xlu1 %1407, %v75_v53   ;;  %p1459_p3 = por %p1458_p2, %p1457_p1 }
  0x41   :  { %p1460_p4 = pnand %p1459_p3, %p1453_p0 }
  0x42   :  { %742 = vperm.xlu0 %1406, %v724_v56  }
  0x43   :  { %747 = vperm.xlu1 %1407, %v725_v55  }
  0x46   :  { %752 = vperm.xlu0 %1406, %v726_v58  }
  0x47   :  { %757 = vperm.xlu1 %1407, %v727_v57  }
  0x4a   :  { %1063 = vperm.xlu0 %1406, %v1045_v60  }
  0x4b   :  { %1068 = vperm.xlu1 %1407, %v1046_v59  }
  0x4e   :  { %762 = vperm.xlu0 %1406, %v728_v62  }
  0x4f   :  { %1073 = vperm.xlu1 %1407, %v1047_v61  }
  0x52   :  { %767 = vperm.xlu0 %1406, %v729_v0  }
  0x53   :  { %1078 = vperm.xlu1 %1407, %v1048_v63  }
  0x56   :  { %772 = vperm.xlu0 %1406, %v730_v2  }
  0x57   :  { %1083 = vperm.xlu1 %1407, %v1049_v1  }
  0x5a   :  { %777 = vperm.xlu0 %1406, %v731_v4  }
  0x5b   :  { %1088 = vperm.xlu1 %1407, %v1050_v3  }
  0x5e   :  { %782 = vperm.xlu0 %1406, %v732_v6  }
  0x5f   :  { %1093 = vperm.xlu1 %1407, %v1051_v5  }
  0x62   :  { %787 = vperm.xlu0 %1406, %v733_v8  }
  0x63   :  { %1098 = vperm.xlu1 %1407, %v1052_v7  }
  0x66   :  { %792 = vperm.xlu0 %1406, %v734_v10  }
  0x67   :  { %1103 = vperm.xlu1 %1407, %v1053_v9  }
  0x6a   :  { %797 = vperm.xlu0 %1406, %v735_v12  }
  0x6b   :  { %1108 = vperm.xlu1 %1407, %v1054_v11  }
  0x6e   :  { %802 = vperm.xlu0 %1406, %v736_v14  }
  0x6f   :  { %1113 = vperm.xlu1 %1407, %v1055_v13  }
  0x72   :  { %807 = vperm.xlu0 %1406, %v737_v16  }
  0x73   :  { %1118 = vperm.xlu1 %1407, %v1056_v15  }
  0x76   :  { %812 = vperm.xlu0 %1406, %v738_v18  }
  0x77   :  { %1123 = vperm.xlu1 %1407, %v1057_v17  }
  0x7a   :  { %817 = vperm.xlu0 %1406, %v739_v20  }
  0x7b   :  { %1128 = vperm.xlu1 %1407, %v1058_v19  }
  0x7d   :  { %v472_v26 = vpop.permute.xlu0 %471 }
  0x7e   :  { %1133 = vperm.xlu0 %1406, %v1059_v22   ;;  %v163_v25 = vpop.permute.xlu1 %162 }
  0x7f   :  { %1138 = vperm.xlu1 %1407, %v1060_v21  }
  0x81   :  { %v1805_v28 = vpop.permute.xlu0 %476 }
  0x82   :  { %v1803_v27 = vpop.permute.xlu1 %167 }
  0x85   :  { %v1809_v30 = vpop.permute.xlu0 %461 }
  0x86   :  { %v1807_v29 = vpop.permute.xlu1 %466 }
  0x89   :  { %v153_v32 = vpop.permute.xlu0 %152 }
  0x8a   :  { %v1811_v31 = vpop.permute.xlu1 %157 }
  0x8d   :  { %v452_v34 = vpop.permute.xlu0 %451 }
  0x8e   :  { %v457_v33 = vpop.permute.xlu1 %456 }
  0x91   :  { %v143_v36 = vpop.permute.xlu0 %142 }
  0x92   :  { %v148_v35 = vpop.permute.xlu1 %147 }
  0x95   :  { %v1813_v38 = vpop.permute.xlu0 %441 }
  0x96   :  { %v447_v37 = vpop.permute.xlu1 %446 }
  0x99   :  { %v1817_v40 = vpop.permute.xlu0 %132 }
  0x9a   :  { %v1815_v39 = vpop.permute.xlu1 %137 }
  0x9d   :  { %v432_v42 = vpop.permute.xlu0 %431 }
  0x9e   :  { %v1819_v41 = vpop.permute.xlu1 %436 }
  0xa1   :  { %v123_v44 = vpop.permute.xlu0 %122 }
  0xa2   :  { %v128_v43 = vpop.permute.xlu1 %127 }
  0xa5   :  { %v422_v52 = vpop.permute.xlu0 %421 }
  0xa6   :  { %v1827_v51 = vpop.permute.xlu1 %426 }
  0xa9   :  { %v1837_v60 = vpop.permute.xlu0 %112 }
  0xaa   :  { %v1835_v59 = vpop.permute.xlu1 %117 }
  0xad   :  { %v412_v4 = vpop.permute.xlu0 %411 }
  0xae   :  { %v1845_v3 = vpop.permute.xlu1 %416 }
  0xb1   :  { %v103_v12 = vpop.permute.xlu0 %102 }
  0xb2   :  { %v108_v11 = vpop.permute.xlu1 %107 }
  0xcc   :  { %v1354_v45 = vpop.f32.mrf.mxu0 }
  0xcd   :  { %v1372_v46 = vpop.f32.mrf.mxu1  ;;  %v1853_v16 = vadd.f32 %v1354_v45, %v103_v12 }
  0xce   :  { %v1821_v47 = vpop.f32.mrf.mxu0  ;;  %v1855_v17 = vadd.f32 %v1372_v46, %v412_v4 }
  0xcf   :  { %2089 = vst [vmem:[#allocation6_spill] sm:$0xff] %v1821_v47  ;;  %v1823_v48 = vpop.f32.mrf.mxu1 }
  0xd0   :  { %v1355_v49 = vpop.f32.mrf.mxu0 }
  0xd1   :  { %v1825_v50 = vpop.f32.mrf.mxu1  ;;  %v1857_v18 = vadd.f32 %v1355_v49, %v108_v11 }
  0xd2   :  { %v1829_v53 = vpop.f32.mrf.mxu0 }
  0xd3   :  { %v1831_v54 = vpop.f32.mrf.mxu1 }
  0xd4   :  { %v1358_v55 = vpop.f32.mrf.mxu0 }
  0xd5   :  { %v1376_v56 = vpop.f32.mrf.mxu1  ;;  %v1859_v19 = vadd.f32 %v1358_v55, %v123_v44 }
  0xd6   :  { %v1833_v57 = vpop.f32.mrf.mxu0  ;;  %v1861_v20 = vadd.f32 %v1376_v56, %v432_v42 }
  0xd7   :  { %v597_v58 = vpop.f32.mrf.mxu1 }
  0xd8   :  { %v1359_v61 = vpop.f32.mrf.mxu0  ;;  %v1863_v21 = vadd.f32 %v597_v58, %v422_v52 }
  0xd9   :  { %v1839_v62 = vpop.f32.mrf.mxu1 }
  0xda   :  { %v1841_v63 = vpop.f32.mrf.mxu0 }
  0xdb   :  { %v1843_v0 = vpop.f32.mrf.mxu1 }
  0xdc   :  { %v1362_v1 = vpop.f32.mrf.mxu0 }
  0xdd   :  { %v1380_v2 = vpop.f32.mrf.mxu1 }
  0xde   :  { %v1847_v5 = vpop.f32.mrf.mxu0  ;;  %v622_v4 = vadd.f32 %v1380_v2, %v452_v34 }
  0xdf   :  { %v613_v6 = vpop.f32.mrf.mxu1 }
  0xe0   :  { %v1363_v7 = vpop.f32.mrf.mxu0  ;;  %vm654_vm11 = vcmp.gt.f32.partialorder %v622_v4, 0.0 }
  0xe1   :  { %v1381_v8 = vpop.f32.mrf.mxu1  ;;  %v1870_v49 = vadd.f32 %v1363_v7, %v148_v35 }
  0xe2   :  { %v1849_v9 = vpop.f32.mrf.mxu0  ;;  %v1851_v13 = vadd.f32 %v1381_v8, %v457_v33  ;;  %v1865_v33 = vadd.f32 %v1359_v61, %v128_v43  ;;  %v1867_v8 = vadd.f32 %v1362_v1, %v143_v36 }
  0xe3   :  { %v616_v10 = vpop.f32.mrf.mxu1  ;;  %vm346_vm12 = vcmp.gt.f32.partialorder %v1870_v49, 0.0 }
  0xe4   :  { %v1366_v14 = vpop.f32.mrf.mxu0  ;;  %vm655_vm2 = vcmp.gt.f32.partialorder %v1851_v13, 0.0  ;;  %v1873_v42 = vadd.f32 %v616_v10, %v447_v37  ;;  %vm345_vm14 = vcmp.gt.f32.partialorder %v1867_v8, 0.0 }
  0xe5   :  { %v1384_v15 = vpop.f32.mrf.mxu1  ;;  %v329_v22 = vadd.f32 %v1366_v14, %v163_v25  ;;  %v671_v25 = vmul.f32 0.2, %v1851_v13  ;;  %v614_v14 = vadd.f32 %v613_v6, %v1813_v38  ;;  %v361_v6 = vmul.f32 0.2, %v1867_v8 }
  0xe6   :  { %v638_v23 = vadd.f32 %v1384_v15, %v472_v26  ;;  %v320_v24 = vpop.f32.mrf.mxu0  ;;  %vm653_vm13 = vcmp.gt.f32.partialorder %v1873_v42, 0.0 }
  0xe7   :  { %v629_v47 = vpop.f32.mrf.mxu1  ;;  %v321_v45 = vadd.f32 %v320_v24, %v153_v32  ;;  %vm349_vm3 = vcmp.gt.f32.partialorder %v329_v22, 0.0  ;;  %v365_v26 = vmul.f32 0.2, %v329_v22  ;;  %v308_v24 = vadd.f32 %v1849_v9, %v1815_v39 }
  0xe8   :  { %v630_v46 = vadd.f32 %v629_v47, %v1809_v30  ;;  %v1367_v44 = vpop.f32.mrf.mxu0  ;;  %vm658_vm4 = vcmp.gt.f32.partialorder %v638_v23, 0.0  ;;  %v674_v43 = vmul.f32 0.2, %v638_v23  ;;  %v687_v38 = vsel %vm655_vm2, %v1851_v13, %v671_v25 }
  0xe9   :  { %v1385_v52 = vpop.f32.mrf.mxu1  ;;  %v363_v36 = vmul.f32 0.2, %v321_v45  ;;  %v332_v32 = vadd.f32 %v1367_v44, %v1803_v27  ;;  %v381_v61 = vsel %vm349_vm3, %v329_v22, %v365_v26  ;;  %vm347_vm10 = vcmp.gt.f32.partialorder %v321_v45, 0.0 }
  0xea   :  { %v641_v30 = vadd.f32 %v1385_v52, %v1805_v28  ;;  %v323_v34 = vpop.f32.mrf.mxu0  ;;  %vm656_vm5 = vcmp.gt.f32.partialorder %v630_v46, 0.0  ;;  %v672_v47 = vmul.f32 0.2, %v630_v46  ;;  %v690_v28 = vsel %vm658_vm4, %v638_v23, %v674_v43 }
  0xeb   :  { %v632_v35 = vpop.f32.mrf.mxu1  ;;  %v324_v37 = vadd.f32 %v323_v34, %v1811_v31  ;;  %vm350_vm6 = vcmp.gt.f32.partialorder %v332_v32, 0.0  ;;  %v366_v56 = vmul.f32 0.2, %v332_v32  ;;  %v362_v22 = vmul.f32 0.2, %v1870_v49 }
  0xec   :  { %v633_v55 = vadd.f32 %v632_v35, %v1807_v29  ;;  %vm659_vm7 = vcmp.gt.f32.partialorder %v641_v30, 0.0  ;;  %v675_v58 = vmul.f32 0.2, %v641_v30  ;;  %v688_v31 = vsel %vm656_vm5, %v630_v46, %v672_v47 }
  0xed   :  { %v364_v1 = vmul.f32 0.2, %v324_v37  ;;  %v382_v27 = vsel %vm350_vm6, %v332_v32, %v366_v56  ;;  %vm348_vm9 = vcmp.gt.f32.partialorder %v324_v37, 0.0  ;;  %v670_v29 = vmul.f32 0.2, %v622_v4 }
  0xee   :  { %vm657_vm8 = vcmp.gt.f32.partialorder %v633_v55, 0.0  ;;  %v673_v2 = vmul.f32 0.2, %v633_v55  ;;  %v691_v7 = vsel %vm659_vm7, %v641_v30, %v675_v58  ;;  %v699_v10 = vpack.c.bf16 %v382_v27, %v381_v61 }
  0xef   :  { %v707_v11 = vpack.c.bf16 %v691_v7, %v690_v28  ;;  %v380_v44 = vsel %vm348_vm9, %v324_v37, %v364_v1  ;;  %v609_v23 = vadd.f32 %v1839_v62, %v1819_v41  ;;  %v669_v46 = vmul.f32 0.2, %v1873_v42 }
  0xf0   :  { %v689_v12 = vsel %vm657_vm8, %v633_v55, %v673_v2  ;;  %v305_v39 = vadd.f32 %v1847_v5, %v1817_v40  ;;  %v379_v9 = vsel %vm347_vm10, %v321_v45, %v363_v36  ;;  %v668_v41 = vmul.f32 0.2, %v614_v14 }
  0xf1   :  { %v706_v15 = vpack.c.bf16 %v689_v12, %v688_v31  ;;  %1286 = vmatprep.subr.bf16.mxu0 %v707_v11  ;;  %1386 = vmatprep.subr.bf16.mxu1 %v707_v11  ;;  %v698_v62 = vpack.c.bf16 %v380_v44, %v379_v9  ;;  %v686_v52 = vsel %vm654_vm11, %v622_v4, %v670_v29  ;;  %vm652_vm15 = vcmp.gt.f32.partialorder %v614_v14, 0.0 }
  0xf2   :  { %1287 = vmatpush3.bf16.msra.mxu0 %v699_v10  ;;  %1394 = vmatpush3.bf16.msra.mxu1 %v699_v10  ;;  %v378_v13 = vsel %vm346_vm12, %v1870_v49, %v362_v22  ;;  %v360_v25 = vmul.f32 0.2, %v308_v24  ;;  %v705_v26 = vpack.c.bf16 %v687_v38, %v686_v52  ;;  %v667_v40 = vmul.f32 0.2, %v609_v23  ;;  %v2090_v22 = vld [vmem:[#allocation6_spill] sm:$0xff] }
  0xf3   :  { %1288 = vmatprep.subr.bf16.mxu0 %v706_v15  ;;  %1387 = vmatprep.subr.bf16.mxu1 %v706_v15  ;;  %v601_v5 = vadd.f32 %v1843_v0, %v1827_v51  ;;  %vm344_vm0 = vcmp.gt.f32.partialorder %v308_v24, 0.0  ;;  %v685_v45 = vsel %vm653_vm13, %v1873_v42, %v669_v46  ;;  %vm650_vm2 = vcmp.gt.f32.partialorder %v1861_v20, 0.0 }
  0xf4   :  { %vm651_vm3 = vcmp.gt.f32.partialorder %v609_v23, 0.0  ;;  %v377_v4 = vsel %vm345_vm14, %v1867_v8, %v361_v6  ;;  %v359_v49 = vmul.f32 0.2, %v305_v39  ;;  %v666_v43 = vmul.f32 0.2, %v1861_v20  ;;  %v407_v8 = vpop.permute.xlu1 %406 }
  0xf5   :  { %vm343_vm4 = vcmp.gt.f32.partialorder %v305_v39, 0.0  ;;  %v697_v51 = vpack.c.bf16 %v378_v13, %v377_v4  ;;  %v684_v0 = vsel %vm652_vm15, %v614_v14, %v668_v41  ;;  %vm646_vm5 = vcmp.gt.f32.partialorder %v1855_v17, 0.0  ;;  %v1435_v4 = vld [vmem:[%s2084_s6 + $0x50] ss:$8 sps:$4 sm:$0xff]  }
  0xf6   :  { %1289 = vmatpush3.bf16.msra.mxu0 %v698_v62  ;;  %1395 = vmatpush3.bf16.msra.mxu1 %v698_v62  ;;  %v358_v42 = vmul.f32 0.2, %v1865_v33  ;;  %v292_v36 = vadd.f32 %v1841_v63, %v1835_v59  ;;  %v376_v32 = vsel %vm344_vm0, %v308_v24, %v360_v25  ;;  %v704_v30 = vpack.c.bf16 %v685_v45, %v684_v0  ;;  %v402_v63 = vpop.permute.xlu0 %401  ;;  %v1434_v45 = vld [vmem:[%s2084_s6 + $0x10] ss:$8 sps:$4 sm:$0xff]   ;;  %v1441_v0 = vld [vmem:[%s2084_s6 + $0x60] ss:$8 sps:$4 sm:$0xff]  }
  0xf7   :  { %1290 = vmatprep.subr.bf16.mxu0 %v705_v26  ;;  %1388 = vmatprep.subr.bf16.mxu1 %v705_v26  ;;  %v593_v34 = vadd.f32 %v1825_v50, %v1845_v3  ;;  %vm342_vm6 = vcmp.gt.f32.partialorder %v1865_v33, 0.0  ;;  %v665_v35 = vmul.f32 0.2, %v601_v5  ;;  %v683_v47 = vsel %vm651_vm3, %v609_v23, %v667_v40  ;;  %v1424_v26 = vld [vmem:[%s2084_s6] ss:$8 sps:$4 sm:$0xff]  }
  0xf8   :  { %v357_v37 = vmul.f32 0.2, %v1859_v19  ;;  %v289_v55 = vadd.f32 %v1833_v57, %v1837_v60  ;;  %vm649_vm7 = vcmp.gt.f32.partialorder %v601_v5, 0.0  ;;  %v375_v59 = vsel %vm343_vm4, %v305_v39, %v359_v49  ;;  %v1430_v40 = vld [vmem:[%s2084_s6 + $0x14] ss:$8 sps:$4 sm:$0xff]  }
  0xf9   :  { %vm341_vm8 = vcmp.gt.f32.partialorder %v1859_v19, 0.0  ;;  %v664_v50 = vmul.f32 0.2, %v1863_v21  ;;  %v696_v3 = vpack.c.bf16 %v376_v32, %v375_v59  ;;  %v682_v56 = vsel %vm650_vm2, %v1861_v20, %v666_v43  ;;  %v1436_v49 = vld [vmem:[%s2084_s6 + $0x24] ss:$8 sps:$4 sm:$0xff]  }
  0xfa   :  { %1291 = vmatpush3.bf16.msra.mxu0 %v697_v51  ;;  %1396 = vmatpush3.bf16.msra.mxu1 %v697_v51  ;;  %vm648_vm9 = vcmp.gt.f32.partialorder %v1863_v21, 0.0  ;;  %v374_v57 = vsel %vm342_vm6, %v1865_v33, %v358_v42  ;;  %v356_v60 = vmul.f32 0.2, %v292_v36  ;;  %v703_v58 = vpack.c.bf16 %v683_v47, %v682_v56  ;;  %v98_v33 = vpop.permute.xlu1 %97  ;;  %v1438_v43 = vld [vmem:[%s2084_s6 + $0x64] ss:$8 sps:$4 sm:$0xff]  }
  0xfb   :  { %1292 = vmatprep.subr.bf16.mxu0 %v704_v30  ;;  %1389 = vmatprep.subr.bf16.mxu1 %v704_v30  ;;  %v663_v61 = vmul.f32 0.2, %v593_v34  ;;  %v585_v1 = vadd.f32 %v1831_v54, %v407_v8  ;;  %vm340_vm10 = vcmp.gt.f32.partialorder %v292_v36, 0.0  ;;  %v681_v2 = vsel %vm649_vm7, %v601_v5, %v665_v35  ;;  %v1432_v5 = vld [vmem:[%s2084_s6 + $0x54] ss:$8 sps:$4 sm:$0xff]  }
  0xfc   :  { %v662_v27 = vmul.f32 0.2, %v1855_v17  ;;  %vm647_vm11 = vcmp.gt.f32.partialorder %v593_v34, 0.0  ;;  %v373_v20 = vsel %vm341_vm8, %v1859_v19, %v357_v37  ;;  %v355_v28 = vmul.f32 0.2, %v289_v55  ;;  %v93_v19 = vpop.permute.xlu0 %92 }
  0xfd   :  { %v582_v7 = vadd.f32 %v1823_v48, %v402_v63  ;;  %vm339_vm12 = vcmp.gt.f32.partialorder %v289_v55, 0.0  ;;  %v695_v54 = vpack.c.bf16 %v374_v57, %v373_v20  ;;  %v680_v10 = vsel %vm648_vm9, %v1863_v21, %v664_v50  ;;  %v1440_v51 = vld [vmem:[%s2084_s6 + $0x20] ss:$8 sps:$4 sm:$0xff]   ;;  %v1442_v42 = vld [vmem:[%s2084_s6 + $0x34] ss:$8 sps:$4 sm:$0xff]  }
  0xfe   :  { %1293 = vmatpush3.bf16.msra.mxu0 %v696_v3  ;;  %1397 = vmatpush3.bf16.msra.mxu1 %v696_v3  ;;  %v354_v11 = vmul.f32 0.2, %v1857_v18  ;;  %v276_v31 = vadd.f32 %v1829_v53, %v98_v33  ;;  %v372_v12 = vsel %vm340_vm10, %v292_v36, %v356_v60  ;;  %v702_v29 = vpack.c.bf16 %v681_v2, %v680_v10  ;;  %v1444_v36 = vld [vmem:[%s2084_s6 + $0x74] ss:$8 sps:$4 sm:$0xff]   ;;  %v1446_v32 = vld [vmem:[%s2084_s6 + $0x30] ss:$8 sps:$4 sm:$0xff]  }
  0xff   :  { %1294 = vmatprep.subr.bf16.mxu0 %v703_v58  ;;  %1390 = vmatprep.subr.bf16.mxu1 %v703_v58  ;;  %vm338_vm13 = vcmp.gt.f32.partialorder %v1857_v18, 0.0  ;;  %v661_v14 = vmul.f32 0.2, %v585_v1  ;;  %v679_v48 = vsel %vm647_vm11, %v593_v34, %v663_v61  ;;  %v353_v15 = vmul.f32 0.2, %v1853_v16  ;;  %v748_v34 = vpop.permute.xlu1 %747 }
 0x100   :  { %v273_v24 = vadd.f32 %v2090_v22, %v93_v19  ;;  %vm645_vm14 = vcmp.gt.f32.partialorder %v585_v1, 0.0  ;;  %v371_v21 = vsel %vm339_vm12, %v289_v55, %v355_v28  ;;  %vm337_vm15 = vcmp.gt.f32.partialorder %v1853_v16, 0.0  ;;  %v1447_v30 = vld [vmem:[%s2084_s6 + $0x70] ss:$8 sps:$4 sm:$0xff]   ;;  %v743_v8 = vpop.permute.xlu0 %742 }
 0x101   :  { %v660_v53 = vmul.f32 0.2, %v582_v7  ;;  %v694_v44 = vpack.c.bf16 %v372_v12, %v371_v21  ;;  %v678_v23 = vsel %vm646_vm5, %v1855_v17, %v662_v27  ;;  %vm644_vm0 = vcmp.gt.f32.partialorder %v582_v7, 0.0 }
 0x102   :  { %1295 = vmatpush3.bf16.msra.mxu0 %v695_v54  ;;  %1398 = vmatpush3.bf16.msra.mxu1 %v695_v54  ;;  %v370_v46 = vsel %vm338_vm13, %v1857_v18, %v354_v11  ;;  %v352_v38 = vmul.f32 0.2, %v276_v31  ;;  %v701_v6 = vpack.c.bf16 %v679_v48, %v678_v23  ;;  %vm336_vm2 = vcmp.gt.f32.partialorder %v276_v31, 0.0 }
 0x103   :  { %1296 = vmatprep.subr.bf16.mxu0 %v702_v29  ;;  %1391 = vmatprep.subr.bf16.mxu1 %v702_v29  ;;  %v677_v39 = vsel %vm645_vm14, %v585_v1, %v661_v14  ;;  %v369_v9 = vsel %vm337_vm15, %v1853_v16, %v353_v15  ;;  %v351_v41 = vmul.f32 0.2, %v273_v24  ;;  %vm335_vm3 = vcmp.gt.f32.partialorder %v273_v24, 0.0  ;;  %v1427_v16 = vld [vmem:[%s2084_s6 + $0x40] ss:$8 sps:$4 sm:$0xff]   ;;  %v758_v47 = vpop.permute.xlu1 %757 }
 0x104   :  { %v693_v62 = vpack.c.bf16 %v370_v46, %v369_v9  ;;  %v676_v52 = vsel %vm644_vm0, %v582_v7, %v660_v53  ;;  %v368_v17 = vsel %vm336_vm2, %v276_v31, %v352_v38  ;;  %v753_v35 = vpop.permute.xlu0 %752 }
 0x105   :  { %v700_v13 = vpack.c.bf16 %v677_v39, %v676_v52  ;;  %v367_v25 = vsel %vm335_vm3, %v273_v24, %v351_v41 }
 0x106   :  { %1297 = vmatpush3.bf16.msra.mxu0 %v694_v44  ;;  %1399 = vmatpush3.bf16.msra.mxu1 %v694_v44  ;;  %v692_v18 = vpack.c.bf16 %v368_v17, %v367_v25 }
 0x107   :  { %1298 = vmatprep.subr.bf16.mxu0 %v701_v6  ;;  %1392 = vmatprep.subr.bf16.mxu1 %v701_v6  ;;  %v2007_v55 = vpop.permute.xlu1 %1068 }
 0x108   :  { %v2005_v37 = vpop.permute.xlu0 %1063 }
 0x10a   :  { %1299 = vmatpush3.bf16.msra.mxu0 %v693_v62  ;;  %1400 = vmatpush3.bf16.msra.mxu1 %v693_v62 }
 0x10b   :  { %1300 = vmatprep.subr.bf16.mxu0 %v700_v13  ;;  %1393 = vmatprep.subr.bf16.mxu1 %v700_v13  ;;  %v2009_v63 = vpop.permute.xlu1 %1073 }
 0x10c   :  { %v763_v59 = vpop.permute.xlu0 %762 }
 0x10e   :  { %1301 = vmatpush3.bf16.msra.mxu0 %v692_v18  ;;  %1401 = vmatpush3.bf16.msra.mxu1 %v692_v18 }
 0x10f   :  { %v2013_v3 = vpop.permute.xlu1 %1078 }
 0x110   :  { %v2011_v50 = vpop.permute.xlu0 %767 }
 0x111   :  { %933 = vmatmul.mubr.bf16.vlgmr.msra.gmra.mxu0 %v1424_v26  ;;  %965 = vmatmul.mubr.bf16.vlgmr.msra.gmra.mxu1 %v1427_v16 }
 0x112   :  { %940 = vmatprep.mubr.bf16.mxu0 %v1430_v40  ;;  %972 = vmatprep.mubr.bf16.mxu1 %v1432_v5 }
 0x113   :  { %v2017_v57 = vpop.permute.xlu1 %1083 }
 0x114   :  { %v2015_v56 = vpop.permute.xlu0 %772 }
 0x117   :  { %v2021_v58 = vpop.permute.xlu1 %1088 }
 0x118   :  { %v2019_v60 = vpop.permute.xlu0 %777 }
 0x119   :  { %941 = vmatmul.mubr.bf16.gmra.mxu0 %v1434_v45  ;;  %973 = vmatmul.mubr.bf16.gmra.mxu1 %v1435_v4 }
 0x11a   :  { %948 = vmatprep.mubr.bf16.mxu0 %v1436_v49  ;;  %980 = vmatprep.mubr.bf16.mxu1 %v1438_v43 }
 0x11b   :  { %v2023_v28 = vpop.permute.xlu1 %1093 }
 0x11c   :  { %v783_v61 = vpop.permute.xlu0 %782 }
 0x11f   :  { %v2027_v19 = vpop.permute.xlu1 %1098 }
 0x120   :  { %v2025_v54 = vpop.permute.xlu0 %787 }
 0x121   :  { %949 = vmatmul.mubr.bf16.gmra.mxu0 %v1440_v51  ;;  %981 = vmatmul.mubr.bf16.gmra.mxu1 %v1441_v0 }
 0x122   :  { %956 = vmatprep.mubr.bf16.mxu0 %v1442_v42  ;;  %988 = vmatprep.mubr.bf16.mxu1 %v1444_v36 }
 0x123   :  { %v2031_v39 = vpop.permute.xlu1 %1103 }
 0x124   :  { %v2029_v22 = vpop.permute.xlu0 %792 }
 0x127   :  { %v2035_v43 = vpop.permute.xlu1 %1108 }
 0x128   :  { %v2033_v17 = vpop.permute.xlu0 %797 }
 0x129   :  { %957 = vmatmul.mubr.bf16.gmra.mxu0 %v1446_v32  ;;  %989 = vmatmul.mubr.bf16.gmra.mxu1 %v1447_v30 }
 0x1d1   :  { %v1302_v1 = vpop.f32.mrf.mxu0  ;;  %v1326_v2 = vpop.f32.mrf.mxu1 }
 0x1d3   :  { %v1303_v27 = vpop.f32.mrf.mxu0  ;;  %v1327_v20 = vpop.f32.mrf.mxu1 }
 0x1d4   :  { %v1304_v14 = vadd.f32 %v1303_v27, %v1302_v1  ;;  %v1328_v25 = vadd.f32 %v1327_v20, %v1326_v2 }
 0x1d5   :  { %v1305_v33 = vpop.f32.mrf.mxu0  ;;  %v1329_v7 = vpop.f32.mrf.mxu1 }
 0x1d6   :  { %v935_v23 = vadd.f32 %v1304_v14, %v743_v8  ;;  %v967_v42 = vadd.f32 %v1328_v25, %v783_v61 }
 0x1d7   :  { %v1306_v10 = vpop.f32.mrf.mxu0  ;;  %v1330_v11 = vpop.f32.mrf.mxu1 }
 0x1d8   :  { %v1307_v31 = vadd.f32 %v1306_v10, %v1305_v33  ;;  %v1013_v13 = vmul.f32 0.2, %v935_v23  ;;  %vm997_vm5 = vcmp.gt.f32.partialorder %v935_v23, 0.0  ;;  %v1331_v2 = vadd.f32 %v1330_v11, %v1329_v7 }
 0x1d9   :  { %v1308_v12 = vpop.f32.mrf.mxu0  ;;  %v1332_v29 = vpop.f32.mrf.mxu1  ;;  %vm1005_vm9 = vcmp.gt.f32.partialorder %v967_v42, 0.0 }
 0x1da   :  { %v938_v21 = vadd.f32 %v1307_v31, %v748_v34  ;;  %v1029_v0 = vsel %vm997_vm5, %v935_v23, %v1013_v13  ;;  %v803_v34 = vpop.permute.xlu0 %802 }
 0x1db   :  { %v1309_v48 = vpop.f32.mrf.mxu0  ;;  %v1333_v15 = vpop.f32.mrf.mxu1  ;;  %v1141_v10 = vmul.f32 %v2005_v37, %v1029_v0 }
 0x1dc   :  { %v1310_v24 = vadd.f32 %v1309_v48, %v1308_v12  ;;  %v1014_v9 = vmul.f32 0.2, %v938_v21  ;;  %vm998_vm4 = vcmp.gt.f32.partialorder %v938_v21, 0.0  ;;  %v1021_v12 = vmul.f32 0.2, %v967_v42 }
 0x1dd   :  { %v1311_v53 = vpop.f32.mrf.mxu0  ;;  %v1335_v44 = vpop.f32.mrf.mxu1 }
 0x1de   :  { %v943_v46 = vadd.f32 %v1310_v24, %v753_v35  ;;  %v1030_v45 = vsel %vm998_vm4, %v938_v21, %v1014_v9  ;;  %v2043_v24 = vpop.permute.xlu1 %1113  ;;  %v970_v21 = vadd.f32 %v1331_v2, %v2025_v54  ;;  %v808_v23 = vpop.permute.xlu0 %807 }
 0x1df   :  { %v1312_v38 = vpop.f32.mrf.mxu0  ;;  %v1336_v6 = vpop.f32.mrf.mxu1  ;;  %v1142_v35 = vmul.f32 %v2007_v55, %v1030_v45 }
 0x1e0   :  { %v1313_v41 = vadd.f32 %v1312_v38, %v1311_v53  ;;  %v1015_v18 = vmul.f32 0.2, %v943_v46  ;;  %vm999_vm6 = vcmp.gt.f32.partialorder %v943_v46, 0.0  ;;  %v1337_v53 = vadd.f32 %v1336_v6, %v1335_v44 }
 0x1e1   :  { %v1314_v62 = vpop.f32.mrf.mxu0  ;;  %v1338_v52 = vpop.f32.mrf.mxu1  ;;  %v1158_v55 = vsel %vm519_vm1, %v1142_v35, 0.0  ;;  %v1037_v38 = vsel %vm1005_vm9, %v967_v42, %v1021_v12  ;;  %vm1006_vm12 = vcmp.gt.f32.partialorder %v970_v21, 0.0 }
 0x1e2   :  { %v946_v40 = vadd.f32 %v1313_v41, %v758_v47  ;;  %v1031_v36 = vsel %vm999_vm6, %v943_v46, %v1015_v18  ;;  %v1022_v18 = vmul.f32 0.2, %v970_v21 }
 0x1e3   :  { %v1315_v26 = vpop.f32.mrf.mxu0  ;;  %v1339_v16 = vpop.f32.mrf.mxu1  ;;  %v1143_v31 = vmul.f32 %v2009_v63, %v1031_v36 }
 0x1e4   :  { %v1316_v5 = vadd.f32 %v1315_v26, %v1314_v62  ;;  %vm1000_vm7 = vcmp.gt.f32.partialorder %v946_v40, 0.0  ;;  %v1016_v51 = vmul.f32 0.2, %v946_v40  ;;  %v1340_v44 = vadd.f32 %v1339_v16, %v1338_v52 }
 0x1e5   :  { %v1317_v4 = vpop.f32.mrf.mxu0  ;;  %v1341_v49 = vpop.f32.mrf.mxu1 }
 0x1e6   :  { %v951_v32 = vadd.f32 %v1316_v5, %v763_v59  ;;  %v1032_v47 = vsel %vm1000_vm7, %v946_v40, %v1016_v51  ;;  %v1334_v59 = vadd.f32 %v1333_v15, %v1332_v29  ;;  %v1160_v29 = vsel %vm519_vm1, %v1143_v31, 0.0 }
 0x1e7   :  { %v1318_v30 = vpop.f32.mrf.mxu0  ;;  %v1342_v8 = vpop.f32.mrf.mxu1  ;;  %v1144_v7 = vmul.f32 %v2013_v3, %v1032_v47  ;;  %v978_v40 = vadd.f32 %v1337_v53, %v2033_v17  ;;  %v983_v16 = vadd.f32 %v1340_v44, %v803_v34  ;;  %v1149_v34 = vmul.f32 %v2031_v39, %v1037_v38 }
 0x1e8   :  { %v1319_v1 = vadd.f32 %v1318_v30, %v1317_v4  ;;  %vm1001_vm8 = vcmp.gt.f32.partialorder %v951_v32, 0.0  ;;  %v1017_v27 = vmul.f32 0.2, %v951_v32  ;;  %v975_v3 = vadd.f32 %v1334_v59, %v2029_v22  ;;  %v1119_v4 = vpop.permute.xlu1 %1118 }
 0x1e9   :  { %v1320_v20 = vpop.f32.mrf.mxu0  ;;  %v1344_v33 = vpop.f32.mrf.mxu1  ;;  %v1162_v54 = vsel %vm519_vm1, %v1144_v7, 0.0  ;;  %v1343_v45 = vadd.f32 %v1342_v8, %v1341_v49  ;;  %v1038_v8 = vsel %vm1006_vm12, %v970_v21, %v1022_v18  ;;  %v1024_v35 = vmul.f32 0.2, %v978_v40 }
 0x1ea   :  { %v954_v61 = vadd.f32 %v1319_v1, %v2011_v50  ;;  %v1033_v14 = vsel %vm1001_vm8, %v951_v32, %v1017_v27  ;;  %v1157_v50 = vsel %vm519_vm1, %v1141_v10, 0.0  ;;  %v1023_v51 = vmul.f32 0.2, %v975_v3 }
 0x1eb   :  { %v1321_v48 = vpop.f32.mrf.mxu0  ;;  %v1345_v11 = vpop.f32.mrf.mxu1  ;;  %v1145_v15 = vmul.f32 %v2017_v57, %v1033_v14  ;;  %v1159_v9 = vadd.f32 %v1158_v55, %v1157_v50  ;;  %vm1007_vm14 = vcmp.gt.f32.partialorder %v975_v3, 0.0  ;;  %v986_v1 = vadd.f32 %v1343_v45, %v808_v23 }
 0x1ec   :  { %vm1002_vm10 = vcmp.gt.f32.partialorder %v954_v61, 0.0  ;;  %v1018_v37 = vmul.f32 0.2, %v954_v61  ;;  %v1322_v46 = vadd.f32 %v1321_v48, %v1320_v20  ;;  %v1346_v36 = vadd.f32 %v1345_v11, %v1344_v33  ;;  %v1124_v33 = vpop.permute.xlu1 %1123 }
 0x1ed   :  { %v1323_v63 = vpop.f32.mrf.mxu0  ;;  %v1347_v25 = vpop.f32.mrf.mxu1  ;;  %v1161_v26 = vadd.f32 %v1160_v29, %v1159_v9  ;;  %v1164_v5 = vsel %vm519_vm1, %v1145_v15, 0.0  ;;  %vm1008_vm15 = vcmp.gt.f32.partialorder %v978_v40, 0.0  ;;  %v1039_v10 = vsel %vm1007_vm14, %v975_v3, %v1023_v51 }
 0x1ee   :  { %v1034_v41 = vsel %vm1002_vm10, %v954_v61, %v1018_v37  ;;  %v959_v13 = vadd.f32 %v1322_v46, %v2015_v56  ;;  %v1025_v31 = vmul.f32 0.2, %v983_v16  ;;  %v1150_v59 = vmul.f32 %v2035_v43, %v1038_v8 }
 0x1ef   :  { %v1324_v62 = vpop.f32.mrf.mxu0  ;;  %v1146_v6 = vmul.f32 %v2021_v58, %v1034_v41  ;;  %v1163_v0 = vadd.f32 %v1162_v54, %v1161_v26  ;;  %v813_v58 = vpop.permute.xlu0 %812  ;;  %vm1009_vm0 = vcmp.gt.f32.partialorder %v983_v16, 0.0  ;;  %v1040_v48 = vsel %vm1008_vm15, %v978_v40, %v1024_v35 }
 0x1f0   :  { %v1325_v57 = vadd.f32 %v1324_v62, %v1323_v63  ;;  %vm1003_vm11 = vcmp.gt.f32.partialorder %v959_v13, 0.0  ;;  %v1019_v22 = vmul.f32 0.2, %v959_v13  ;;  %v1348_v32 = vpop.f32.mrf.mxu1  ;;  %v991_v61 = vadd.f32 %v1346_v36, %v813_v58  ;;  %v1129_v43 = vpop.permute.xlu1 %1128 }
 0x1f1   :  { %v1166_v56 = vsel %vm519_vm1, %v1146_v6, 0.0  ;;  %v1165_v17 = vadd.f32 %v1164_v5, %v1163_v0  ;;  %v1349_v27 = vadd.f32 %v1348_v32, %v1347_v25  ;;  %v1026_v55 = vmul.f32 0.2, %v986_v1 }
 0x1f2   :  { %v962_v52 = vadd.f32 %v1325_v57, %v2019_v60  ;;  %v1035_v42 = vsel %vm1003_vm11, %v959_v13, %v1019_v22  ;;  %v1172_v39 = vsel %vm519_vm1, %v1149_v34, 0.0  ;;  %v1151_v21 = vmul.f32 %v2043_v24, %v1039_v10 }
 0x1f3   :  { %v1147_v30 = vmul.f32 %v2023_v28, %v1035_v42  ;;  %v1167_v2 = vadd.f32 %v1166_v56, %v1165_v17  ;;  %v818_v12 = vpop.permute.xlu0 %817  ;;  %vm1010_vm2 = vcmp.gt.f32.partialorder %v986_v1, 0.0  ;;  %v1027_v53 = vmul.f32 0.2, %v991_v61 }
 0x1f4   :  { %vm1004_vm13 = vcmp.gt.f32.partialorder %v962_v52, 0.0  ;;  %v1020_v49 = vmul.f32 0.2, %v962_v52  ;;  %v994_v11 = vadd.f32 %v1349_v27, %v818_v12  ;;  %v1174_v63 = vsel %vm519_vm1, %v1150_v59, 0.0  ;;  %v1139_v25 = vpop.permute.xlu1 %1138 }
 0x1f5   :  { %v1168_v47 = vsel %vm519_vm1, %v1147_v30, 0.0  ;;  %v1152_v23 = vmul.f32 %v1119_v4, %v1040_v48  ;;  %vm1011_vm3 = vcmp.gt.f32.partialorder %v991_v61, 0.0  ;;  %v1042_v50 = vsel %vm1010_vm2, %v986_v1, %v1026_v55 }
 0x1f6   :  { %v1036_v60 = vsel %vm1004_vm13, %v962_v52, %v1020_v49  ;;  %v1169_v28 = vadd.f32 %v1168_v47, %v1167_v2  ;;  %v1028_v15 = vmul.f32 0.2, %v994_v11  ;;  %v1176_v46 = vsel %vm519_vm1, %v1151_v21, 0.0 }
 0x1f7   :  { %v1148_v20 = vmul.f32 %v2027_v19, %v1036_v60  ;;  %v1041_v19 = vsel %vm1009_vm0, %v983_v16, %v1025_v31  ;;  %vm1012_vm4 = vcmp.gt.f32.partialorder %v994_v11, 0.0  ;;  %v1043_v9 = vsel %vm1011_vm3, %v991_v61, %v1027_v53  ;;  %v1134_v62 = vpop.permute.xlu0 %1133 }
 0x1f8   :  { %v1153_v38 = vmul.f32 %v1124_v33, %v1041_v19  ;;  %v1178_v24 = vsel %vm519_vm1, %v1152_v23, 0.0  ;;  %v1154_v41 = vmul.f32 %v1129_v43, %v1042_v50  ;;  %v1044_v54 = vsel %vm1012_vm4, %v994_v11, %v1028_v15 }
 0x1f9   :  { %v1170_v14 = vsel %vm519_vm1, %v1148_v20, 0.0  ;;  %v1155_v13 = vmul.f32 %v1134_v62, %v1043_v9  ;;  %v1156_v40 = vmul.f32 %v1139_v25, %v1044_v54  ;;  %v1195_v56 = vstv %s2087_s9 }
 0x1fa   :  { %v1171_v7 = vadd.f32 %v1170_v14, %v1169_v28  ;;  %v1180_v6 = vsel %vm519_vm1, %v1153_v38, 0.0  ;;  %v1182_v26 = vsel %vm519_vm1, %v1154_v41, 0.0 }
 0x1fb   :  { %v1184_v5 = vsel %vm519_vm1, %v1155_v13, 0.0  ;;  %v1186_v22 = vsel %vm519_vm1, %v1156_v40, 0.0  ;;  %vm1203_vm1 = vcmask 57344  }
 0x1fc   :  { %v1173_v37 = vadd.f32 %v1172_v39, %v1171_v7 }
 0x1fe   :  { %v1175_v29 = vadd.f32 %v1174_v63, %v1173_v37 }
 0x200   :  { %v1177_v3 = vadd.f32 %v1176_v46, %v1175_v29 }
 0x202   :  { %v1179_v44 = vadd.f32 %v1178_v24, %v1177_v3 }
 0x204   :  { %v1181_v18 = vadd.f32 %v1180_v6, %v1179_v44 }
 0x206   :  { %v1183_v57 = vadd.f32 %v1182_v26, %v1181_v18 }
 0x208   :  { %v1185_v45 = vadd.f32 %v1184_v5, %v1183_v57 }
 0x20a   :  { %v1187_v4 = vadd.f32 %v1186_v22, %v1185_v45 }
 0x20c   :  { %v1188_v51 = vrot.slane %v1187_v4, 4 }
 0x20e   :  { %v1189_v0 = vadd.f32 %v1188_v51, %v1187_v4 }
 0x210   :  { %v1190_v52 = vrot.slane %v1189_v0, 2 }
 0x212   :  { %v1191_v58 = vadd.f32 %v1190_v52, %v1189_v0 }
 0x214   :  { %v1192_v16 = vrot.slane %v1191_v58, 1 }
 0x216   :  { %v1193_v42 = vadd.f32 %v1192_v16, %v1191_v58 }
 0x218   :  { %v1196_v36 = vadd.f32 %v1195_v56, %v1193_v42 }
 0x21a   :  { %v1267_v32 = vmul.f32 -1.442695, %v1196_v36 }
 0x21c   :  { %1448 = vpow2.f32 %v1267_v32 }
 0x229   :  { %v1449_v17 = vpop.eup %1448 }
 0x22a   :  { %v1200_v30 = vadd.f32 1.0, %v1449_v17 }
 0x22c   :  { %1450 = vrcp.f32 %v1200_v30 }
 0x239   :  { %v1451_v49 = vpop.eup %1450 }
 0x23a   :  { %1204 = vst.msk [vmem:[#allocation3] sm:$0x1] %vm1203_vm1, %v1451_v49 }
 0x23b   :  { %1463 = shalt.err (!%p1460_p4)
}
 0x23c   :  { %1214 = dma.vmem_to_hbm [thread:$0]  %s1212_s13, 16, %s2088_s10, [#allocation4]  }
 0x23d   :  { %1472 = dma.done.wait [#allocation4], 16  }
 0x23e   :  { %1473 = vsyncadd [#allocation4], 4294967280 }
 0x23f   :  { %1218 = vsyncpa [#allocation4], 1 }

// kernel: tpu_custom_call.1
= control target key start
LH: loop header
LB: loop body
LE: loop exit
PB: predicated region body
PF: predicated region fallthrough
CT: control target
= control target key end

     0   :  { %vm210_vm0 = vcmask 130048   ;;  %v1474_v3 = vmov 0   ;;  %vm519_vm1 = vcmask 64512   ;;  %s2078_s0 = inlined_call_operand.vmem [shape: f32[8,16], index: 0, kind: input, shape index: {}]   ;;  %s2079_s1 = inlined_call_operand.vmem [shape: f32[8,8], index: 1, kind: input, shape index: {}]   ;;  %s2080_s2 = inlined_call_operand.vmem [shape: bf16[128,16], index: 2, kind: input, shape index: {}]   ;;  %s2081_s3 = inlined_call_operand.vmem [shape: f32[128,1], index: 3, kind: input, shape index: {}]   ;;  %s2082_s4 = inlined_call_operand.vmem [shape: bf16[128,8], index: 4, kind: input, shape index: {}]   ;;  %s2083_s5 = inlined_call_operand.vmem [shape: f32[128,1], index: 5, kind: input, shape index: {}]   ;;  %s2084_s6 = inlined_call_operand.vmem [shape: bf16[128,256], index: 6, kind: input, shape index: {}]   ;;  %s2085_s7 = inlined_call_operand.vmem [shape: f32[128,1], index: 7, kind: input, shape index: {}]   ;;  %s2086_s8 = inlined_call_operand.vmem [shape: f32[128,1], index: 8, kind: input, shape index: {}]   ;;  %s2087_s9 = inlined_call_operand.<no memory space> [shape: f32[1], index: 9, kind: input, shape index: {}]   ;;  %s2088_s10 = inlined_call_operand.hbm [shape: f32[1,1,8], index: 10, kind: output, shape index: {}]  }
   0x1   :  { %v397_v0 = vld [vmem:[%s2083_s5 + $0x70] sm:$0xff]  ;;  %v38_v2 = vld [vmem:[%s2078_s0] sm:$0xff]  ;;  %1407 = vset.pattern.permute.xlu1 %v1474_v3  ;;  %1406 = vset.pattern.permute.xlu0 %v1474_v3  ;;  %v398_v7 = vld [vmem:[%s2083_s5 + $0x78] sm:$0xff] }
   0x2   :  { %v88_v1 = vld [vmem:[%s2081_s3 + $0x70] sm:$0xff]  ;;  %v39_v4 = vpack.c.bf16 %v38_v2, %v38_v2  ;;  %v40_v5 = vld [vmem:[%s2079_s1] sm:$0xff]  ;;  %471 = vperm.xlu0 %1406, %v397_v0   ;;  %v89_v8 = vld [vmem:[%s2081_s3 + $0x78] sm:$0xff] }
   0x3   :  { %162 = vperm.xlu1 %1407, %v88_v1   ;;  %v41_v6 = vpack.c.bf16 %v40_v5, %v40_v5  ;;  %v1408_v10 = vld [vmem:[%s2080_s2] sm:$0xff]   ;;  %v396_v14 = vld [vmem:[%s2083_s5 + $0x68] sm:$0xff]  ;;  %v1412_v17 = vld [vmem:[%s2080_s2 + $0x10] sm:$0xff]  }
   0x4   :  { %1402 = vmatprep.subr.msk.bf16.mxu0 %vm210_vm0, %v39_v4  ;;  %v236_v9 = vsel %vm210_vm0, %v39_v4, 0  ;;  %v1409_v12 = vld [vmem:[%s2082_s4] sm:$0xff]   ;;  %1352 = vmatprep.mubr.msk.bf16.mxu0 %vm210_vm0, %v1408_v10  ;;  %v1410_v15 = vld [vmem:[%s2080_s2 + $0x8] sm:$0xff]   ;;  %v1413_v18 = vld [vmem:[%s2082_s4 + $0x10] sm:$0xff]  }
   0x5   :  { %1403 = vmatprep.subr.msk.bf16.mxu1 %vm519_vm1, %v41_v6  ;;  %1351 = vmatpush3.bf16.xpose.msra.mxu0 %v236_v9  ;;  %v545_v11 = vsel %vm519_vm1, %v41_v6, 0  ;;  %v395_v13 = vld [vmem:[%s2083_s5 + $0x60] sm:$0xff]  ;;  %v1411_v16 = vld [vmem:[%s2082_s4 + $0x8] sm:$0xff]   ;;  %v394_v21 = vld [vmem:[%s2083_s5 + $0x58] sm:$0xff] }
   0x6   :  { %1369 = vmatpush3.bf16.xpose.msra.mxu1 %v545_v11  ;;  %476 = vperm.xlu0 %1406, %v398_v7   ;;  %v87_v19 = vld [vmem:[%s2081_s3 + $0x68] sm:$0xff]  ;;  %v86_v20 = vld [vmem:[%s2081_s3 + $0x60] sm:$0xff]  ;;  %v393_v22 = vld [vmem:[%s2083_s5 + $0x50] sm:$0xff] }
   0x7   :  { %167 = vperm.xlu1 %1407, %v89_v8   ;;  %1370 = vmatprep.mubr.msk.bf16.mxu1 %vm519_vm1, %v1409_v12  ;;  %v1414_v23 = vld [vmem:[%s2080_s2 + $0x18] sm:$0xff]   ;;  %v1416_v25 = vld [vmem:[%s2080_s2 + $0x20] sm:$0xff]   ;;  %v84_v28 = vld [vmem:[%s2081_s3 + $0x50] sm:$0xff] }
   0x8   :  { %v1415_v24 = vld [vmem:[%s2082_s4 + $0x18] sm:$0xff]   ;;  %v1417_v26 = vld [vmem:[%s2082_s4 + $0x20] sm:$0xff]   ;;  %v392_v29 = vld [vmem:[%s2083_s5 + $0x48] sm:$0xff] }
   0x9   :  { %v85_v27 = vld [vmem:[%s2081_s3 + $0x58] sm:$0xff]  ;;  %v391_v30 = vld [vmem:[%s2083_s5 + $0x40] sm:$0xff]  ;;  %v1418_v31 = vld [vmem:[%s2080_s2 + $0x28] sm:$0xff]  }
   0xa   :  { %461 = vperm.xlu0 %1406, %v395_v13   ;;  %v1419_v32 = vld [vmem:[%s2082_s4 + $0x28] sm:$0xff]   ;;  %v1420_v33 = vld [vmem:[%s2080_s2 + $0x30] sm:$0xff]   ;;  %v82_v36 = vld [vmem:[%s2081_s3 + $0x40] sm:$0xff] }
   0xb   :  { %466 = vperm.xlu1 %1407, %v396_v14   ;;  %v1421_v34 = vld [vmem:[%s2082_s4 + $0x30] sm:$0xff]   ;;  %v83_v35 = vld [vmem:[%s2081_s3 + $0x48] sm:$0xff]  ;;  %v390_v37 = vld [vmem:[%s2083_s5 + $0x38] sm:$0xff] }
   0xc   :  { %1353 = vmatmul.mubr.msk.bf16.vlgmr.msra.gmra.mxu0 %vm210_vm0, %v1410_v15  ;;  %v389_v38 = vld [vmem:[%s2083_s5 + $0x30] sm:$0xff]  ;;  %v1422_v39 = vld [vmem:[%s2080_s2 + $0x38] sm:$0xff]   ;;  %v388_v43 = vld [vmem:[%s2083_s5 + $0x28] sm:$0xff] }
   0xd   :  { %1371 = vmatmul.mubr.msk.bf16.vlgmr.msra.gmra.mxu1 %vm519_vm1, %v1411_v16  ;;  %1356 = vmatprep.mubr.msk.bf16.mxu0 %vm210_vm0, %v1412_v17  ;;  %v1423_v40 = vld [vmem:[%s2082_s4 + $0x38] sm:$0xff]   ;;  %v80_v42 = vld [vmem:[%s2081_s3 + $0x30] sm:$0xff]  ;;  %v387_v44 = vld [vmem:[%s2083_s5 + $0x20] sm:$0xff] }
   0xe   :  { %1374 = vmatprep.mubr.msk.bf16.mxu1 %vm519_vm1, %v1413_v18  ;;  %152 = vperm.xlu0 %1406, %v86_v20   ;;  %v81_v41 = vld [vmem:[%s2081_s3 + $0x38] sm:$0xff]  ;;  %v79_v45 = vld [vmem:[%s2081_s3 + $0x28] sm:$0xff]  ;;  %v78_v46 = vld [vmem:[%s2081_s3 + $0x20] sm:$0xff] }
   0xf   :  { %157 = vperm.xlu1 %1407, %v87_v19  }
  0x12   :  { %451 = vperm.xlu0 %1406, %v393_v22  }
  0x13   :  { %456 = vperm.xlu1 %1407, %v394_v21  }
  0x14   :  { %1357 = vmatmul.mubr.msk.bf16.gmra.mxu0 %vm210_vm0, %v1414_v23 }
  0x15   :  { %1375 = vmatmul.mubr.msk.bf16.gmra.mxu1 %vm519_vm1, %v1415_v24  ;;  %1360 = vmatprep.mubr.msk.bf16.mxu0 %vm210_vm0, %v1416_v25 }
  0x16   :  { %1378 = vmatprep.mubr.msk.bf16.mxu1 %vm519_vm1, %v1417_v26  ;;  %142 = vperm.xlu0 %1406, %v84_v28  }
  0x17   :  { %147 = vperm.xlu1 %1407, %v85_v27  }
  0x1a   :  { %441 = vperm.xlu0 %1406, %v391_v30  }
  0x1b   :  { %446 = vperm.xlu1 %1407, %v392_v29  }
  0x1c   :  { %1361 = vmatmul.mubr.msk.bf16.gmra.mxu0 %vm210_vm0, %v1418_v31 }
  0x1d   :  { %1379 = vmatmul.mubr.msk.bf16.gmra.mxu1 %vm519_vm1, %v1419_v32  ;;  %1364 = vmatprep.mubr.msk.bf16.mxu0 %vm210_vm0, %v1420_v33 }
  0x1e   :  { %1382 = vmatprep.mubr.msk.bf16.mxu1 %vm519_vm1, %v1421_v34  ;;  %132 = vperm.xlu0 %1406, %v82_v36  }
  0x1f   :  { %137 = vperm.xlu1 %1407, %v83_v35  }
  0x22   :  { %431 = vperm.xlu0 %1406, %v389_v38  }
  0x23   :  { %436 = vperm.xlu1 %1407, %v390_v37  }
  0x24   :  { %1365 = vmatmul.mubr.msk.bf16.gmra.mxu0 %vm210_vm0, %v1422_v39 }
  0x25   :  { %1383 = vmatmul.mubr.msk.bf16.gmra.mxu1 %vm519_vm1, %v1423_v40 }
  0x26   :  { %122 = vperm.xlu0 %1406, %v80_v42  }
  0x27   :  { %127 = vperm.xlu1 %1407, %v81_v41  }
  0x2a   :  { %421 = vperm.xlu0 %1406, %v387_v44  }
  0x2b   :  { %426 = vperm.xlu1 %1407, %v388_v43  }
  0x2c   :  { %16 = vsyncpa [#allocation4], 0  ;;  %v386_v47 = vld [vmem:[%s2083_s5 + $0x18] sm:$0xff]  ;;  %v385_v48 = vld [vmem:[%s2083_s5 + $0x10] sm:$0xff] }
  0x2d   :  { %v77_v49 = vld [vmem:[%s2081_s3 + $0x18] sm:$0xff]  ;;  %v76_v50 = vld [vmem:[%s2081_s3 + $0x10] sm:$0xff]  ;;  %v384_v51 = vld [vmem:[%s2083_s5 + $0x8] sm:$0xff] }
  0x2e   :  { %112 = vperm.xlu0 %1406, %v78_v46   ;;  %v383_v52 = vld [vmem:[%s2083_s5] sm:$0xff]  ;;  %v75_v53 = vld [vmem:[%s2081_s3 + $0x8] sm:$0xff]  ;;  %v727_v57 = vld [vmem:[%s2085_s7 + $0x18] sm:$0xff] }
  0x2f   :  { %117 = vperm.xlu1 %1407, %v79_v45   ;;  %v74_v54 = vld [vmem:[%s2081_s3] sm:$0xff]  ;;  %v725_v55 = vld [vmem:[%s2085_s7 + $0x8] sm:$0xff]  ;;  %v726_v58 = vld [vmem:[%s2085_s7 + $0x10] sm:$0xff] }
  0x30   :  { %v724_v56 = vld [vmem:[%s2085_s7] sm:$0xff]  ;;  %v1046_v59 = vld [vmem:[%s2086_s8 + $0x8] sm:$0xff]  ;;  %v1047_v61 = vld [vmem:[%s2086_s8 + $0x10] sm:$0xff] }
  0x31   :  { %v1045_v60 = vld [vmem:[%s2086_s8] sm:$0xff]  ;;  %v1048_v63 = vld [vmem:[%s2086_s8 + $0x18] sm:$0xff]  ;;  %v729_v0 = vld [vmem:[%s2085_s7 + $0x28] sm:$0xff] }
  0x32   :  { %411 = vperm.xlu0 %1406, %v385_v48   ;;  %v728_v62 = vld [vmem:[%s2085_s7 + $0x20] sm:$0xff]  ;;  %v730_v2 = vld [vmem:[%s2085_s7 + $0x30] sm:$0xff]  ;;  %v1050_v3 = vld [vmem:[%s2086_s8 + $0x28] sm:$0xff] }
  0x33   :  { %416 = vperm.xlu1 %1407, %v386_v47   ;;  %v1049_v1 = vld [vmem:[%s2086_s8 + $0x20] sm:$0xff]  ;;  %v731_v4 = vld [vmem:[%s2085_s7 + $0x38] sm:$0xff]  ;;  %v1051_v5 = vld [vmem:[%s2086_s8 + $0x30] sm:$0xff] }
  0x34   :  { %v732_v6 = vld [vmem:[%s2085_s7 + $0x40] sm:$0xff]  ;;  %v1052_v7 = vld [vmem:[%s2086_s8 + $0x38] sm:$0xff]  ;;  %v733_v8 = vld [vmem:[%s2085_s7 + $0x48] sm:$0xff] }
  0x35   :  { %v1053_v9 = vld [vmem:[%s2086_s8 + $0x40] sm:$0xff]  ;;  %v734_v10 = vld [vmem:[%s2085_s7 + $0x50] sm:$0xff]  ;;  %v1054_v11 = vld [vmem:[%s2086_s8 + $0x48] sm:$0xff] }
  0x36   :  { %102 = vperm.xlu0 %1406, %v76_v50   ;;  %v735_v12 = vld [vmem:[%s2085_s7 + $0x58] sm:$0xff]  ;;  %v1055_v13 = vld [vmem:[%s2086_s8 + $0x50] sm:$0xff]  ;;  %v736_v14 = vld [vmem:[%s2085_s7 + $0x60] sm:$0xff] }
  0x37   :  { %107 = vperm.xlu1 %1407, %v77_v49   ;;  %v1056_v15 = vld [vmem:[%s2086_s8 + $0x58] sm:$0xff]  ;;  %v737_v16 = vld [vmem:[%s2085_s7 + $0x68] sm:$0xff]  ;;  %v1057_v17 = vld [vmem:[%s2086_s8 + $0x60] sm:$0xff] }
  0x38   :  { %v738_v18 = vld [vmem:[%s2085_s7 + $0x70] sm:$0xff]  ;;  %v1058_v19 = vld [vmem:[%s2086_s8 + $0x68] sm:$0xff]  ;;  %v739_v20 = vld [vmem:[%s2085_s7 + $0x78] sm:$0xff] }
  0x39   :  { %v1060_v21 = vld [vmem:[%s2086_s8 + $0x78] sm:$0xff]  ;;  %v1059_v22 = vld [vmem:[%s2086_s8 + $0x70] sm:$0xff]  ;;  %v1426_v23 = vld [vmem:[%s2084_s6 + $0x4] ss:$8 sps:$4 sm:$0xff]   ;;  %s1475_s8 = smov [#allocation3]  }
  0x3a   :  { %401 = vperm.xlu0 %1406, %v383_v52   ;;  %v1429_v24 = vld [vmem:[%s2084_s6 + $0x44] ss:$8 sps:$4 sm:$0xff]   ;;  %932 = vmatprep.mubr.bf16.mxu0 %v1426_v23  ;;  %s1211_s13 = sshll.u32 %s1475_s8, 4  ;;  %s1212_s13 = int_to_ptr.vmem [resolvable:$true] %s1211_s13 }
  0x3b   :  { %406 = vperm.xlu1 %1407, %v384_v51   ;;  %964 = vmatprep.mubr.bf16.mxu1 %v1429_v24  ;;  %s1452_s14 = scalar_lea.vmem %s1212_s13, 16  ;;  %s1456_s15 = scalar_lea.vmem %s1212_s13, 32 }
  0x3c   :  { %p1453_p0 = scmp.ne.s32.totalorder %s1212_s13, %s1452_s14  ;;  %p1457_p1 = scmp.lt.s32.totalorder %s1212_s13, %s1212_s13 }
  0x3d   :  { %p1458_p2 = scmp.lt.s32.totalorder %s1456_s15, %s1452_s14 }
  0x3e   :  { %92 = vperm.xlu0 %1406, %v74_v54  }
  0x3f   :  { %97 = vperm.xlu1 %1407, %v75_v53   ;;  %p1459_p3 = por %p1458_p2, %p1457_p1 }
  0x41   :  { %p1460_p4 = pnand %p1459_p3, %p1453_p0 }
  0x42   :  { %742 = vperm.xlu0 %1406, %v724_v56  }
  0x43   :  { %747 = vperm.xlu1 %1407, %v725_v55  }
  0x46   :  { %752 = vperm.xlu0 %1406, %v726_v58  }
  0x47   :  { %757 = vperm.xlu1 %1407, %v727_v57  }
  0x4a   :  { %1063 = vperm.xlu0 %1406, %v1045_v60  }
  0x4b   :  { %1068 = vperm.xlu1 %1407, %v1046_v59  }
  0x4e   :  { %762 = vperm.xlu0 %1406, %v728_v62  }
  0x4f   :  { %1073 = vperm.xlu1 %1407, %v1047_v61  }
  0x52   :  { %767 = vperm.xlu0 %1406, %v729_v0  }
  0x53   :  { %1078 = vperm.xlu1 %1407, %v1048_v63  }
  0x56   :  { %772 = vperm.xlu0 %1406, %v730_v2  }
  0x57   :  { %1083 = vperm.xlu1 %1407, %v1049_v1  }
  0x5a   :  { %777 = vperm.xlu0 %1406, %v731_v4  }
  0x5b   :  { %1088 = vperm.xlu1 %1407, %v1050_v3  }
  0x5e   :  { %782 = vperm.xlu0 %1406, %v732_v6  }
  0x5f   :  { %1093 = vperm.xlu1 %1407, %v1051_v5  }
  0x62   :  { %787 = vperm.xlu0 %1406, %v733_v8  }
  0x63   :  { %1098 = vperm.xlu1 %1407, %v1052_v7  }
  0x66   :  { %792 = vperm.xlu0 %1406, %v734_v10  }
  0x67   :  { %1103 = vperm.xlu1 %1407, %v1053_v9  }
  0x6a   :  { %797 = vperm.xlu0 %1406, %v735_v12  }
  0x6b   :  { %1108 = vperm.xlu1 %1407, %v1054_v11  }
  0x6e   :  { %802 = vperm.xlu0 %1406, %v736_v14  }
  0x6f   :  { %1113 = vperm.xlu1 %1407, %v1055_v13  }
  0x72   :  { %807 = vperm.xlu0 %1406, %v737_v16  }
  0x73   :  { %1118 = vperm.xlu1 %1407, %v1056_v15  }
  0x76   :  { %812 = vperm.xlu0 %1406, %v738_v18  }
  0x77   :  { %1123 = vperm.xlu1 %1407, %v1057_v17  }
  0x7a   :  { %817 = vperm.xlu0 %1406, %v739_v20  }
  0x7b   :  { %1128 = vperm.xlu1 %1407, %v1058_v19  }
  0x7d   :  { %v472_v26 = vpop.permute.xlu0 %471 }
  0x7e   :  { %1133 = vperm.xlu0 %1406, %v1059_v22   ;;  %v163_v25 = vpop.permute.xlu1 %162 }
  0x7f   :  { %1138 = vperm.xlu1 %1407, %v1060_v21  }
  0x81   :  { %v1805_v28 = vpop.permute.xlu0 %476 }
  0x82   :  { %v1803_v27 = vpop.permute.xlu1 %167 }
  0x85   :  { %v1809_v30 = vpop.permute.xlu0 %461 }
  0x86   :  { %v1807_v29 = vpop.permute.xlu1 %466 }
  0x89   :  { %v153_v32 = vpop.permute.xlu0 %152 }
  0x8a   :  { %v1811_v31 = vpop.permute.xlu1 %157 }
  0x8d   :  { %v452_v34 = vpop.permute.xlu0 %451 }
  0x8e   :  { %v457_v33 = vpop.permute.xlu1 %456 }
  0x91   :  { %v143_v36 = vpop.permute.xlu0 %142 }
  0x92   :  { %v148_v35 = vpop.permute.xlu1 %147 }
  0x95   :  { %v1813_v38 = vpop.permute.xlu0 %441 }
  0x96   :  { %v447_v37 = vpop.permute.xlu1 %446 }
  0x99   :  { %v1817_v40 = vpop.permute.xlu0 %132 }
  0x9a   :  { %v1815_v39 = vpop.permute.xlu1 %137 }
  0x9d   :  { %v432_v42 = vpop.permute.xlu0 %431 }
  0x9e   :  { %v1819_v41 = vpop.permute.xlu1 %436 }
  0xa1   :  { %v123_v44 = vpop.permute.xlu0 %122 }
  0xa2   :  { %v128_v43 = vpop.permute.xlu1 %127 }
  0xa5   :  { %v422_v52 = vpop.permute.xlu0 %421 }
  0xa6   :  { %v1827_v51 = vpop.permute.xlu1 %426 }
  0xa9   :  { %v1837_v60 = vpop.permute.xlu0 %112 }
  0xaa   :  { %v1835_v59 = vpop.permute.xlu1 %117 }
  0xad   :  { %v412_v4 = vpop.permute.xlu0 %411 }
  0xae   :  { %v1845_v3 = vpop.permute.xlu1 %416 }
  0xb1   :  { %v103_v12 = vpop.permute.xlu0 %102 }
  0xb2   :  { %v108_v11 = vpop.permute.xlu1 %107 }
  0xcc   :  { %v1354_v45 = vpop.f32.mrf.mxu0 }
  0xcd   :  { %v1372_v46 = vpop.f32.mrf.mxu1  ;;  %v1853_v16 = vadd.f32 %v1354_v45, %v103_v12 }
  0xce   :  { %v1821_v47 = vpop.f32.mrf.mxu0  ;;  %v1855_v17 = vadd.f32 %v1372_v46, %v412_v4 }
  0xcf   :  { %2089 = vst [vmem:[#allocation6_spill] sm:$0xff] %v1821_v47  ;;  %v1823_v48 = vpop.f32.mrf.mxu1 }
  0xd0   :  { %v1355_v49 = vpop.f32.mrf.mxu0 }
  0xd1   :  { %v1825_v50 = vpop.f32.mrf.mxu1  ;;  %v1857_v18 = vadd.f32 %v1355_v49, %v108_v11 }
  0xd2   :  { %v1829_v53 = vpop.f32.mrf.mxu0 }
  0xd3   :  { %v1831_v54 = vpop.f32.mrf.mxu1 }
  0xd4   :  { %v1358_v55 = vpop.f32.mrf.mxu0 }
  0xd5   :  { %v1376_v56 = vpop.f32.mrf.mxu1  ;;  %v1859_v19 = vadd.f32 %v1358_v55, %v123_v44 }
  0xd6   :  { %v1833_v57 = vpop.f32.mrf.mxu0  ;;  %v1861_v20 = vadd.f32 %v1376_v56, %v432_v42 }
  0xd7   :  { %v597_v58 = vpop.f32.mrf.mxu1 }
  0xd8   :  { %v1359_v61 = vpop.f32.mrf.mxu0  ;;  %v1863_v21 = vadd.f32 %v597_v58, %v422_v52 }
  0xd9   :  { %v1839_v62 = vpop.f32.mrf.mxu1 }
  0xda   :  { %v1841_v63 = vpop.f32.mrf.mxu0 }
  0xdb   :  { %v1843_v0 = vpop.f32.mrf.mxu1 }
  0xdc   :  { %v1362_v1 = vpop.f32.mrf.mxu0 }
  0xdd   :  { %v1380_v2 = vpop.f32.mrf.mxu1 }
  0xde   :  { %v1847_v5 = vpop.f32.mrf.mxu0  ;;  %v622_v4 = vadd.f32 %v1380_v2, %v452_v34 }
  0xdf   :  { %v613_v6 = vpop.f32.mrf.mxu1 }
  0xe0   :  { %v1363_v7 = vpop.f32.mrf.mxu0  ;;  %vm654_vm11 = vcmp.gt.f32.partialorder %v622_v4, 0.0 }
  0xe1   :  { %v1381_v8 = vpop.f32.mrf.mxu1  ;;  %v1870_v49 = vadd.f32 %v1363_v7, %v148_v35 }
  0xe2   :  { %v1849_v9 = vpop.f32.mrf.mxu0  ;;  %v1851_v13 = vadd.f32 %v1381_v8, %v457_v33  ;;  %v1865_v33 = vadd.f32 %v1359_v61, %v128_v43  ;;  %v1867_v8 = vadd.f32 %v1362_v1, %v143_v36 }
  0xe3   :  { %v616_v10 = vpop.f32.mrf.mxu1  ;;  %vm346_vm12 = vcmp.gt.f32.partialorder %v1870_v49, 0.0 }
  0xe4   :  { %v1366_v14 = vpop.f32.mrf.mxu0  ;;  %vm655_vm2 = vcmp.gt.f32.partialorder %v1851_v13, 0.0  ;;  %v1873_v42 = vadd.f32 %v616_v10, %v447_v37  ;;  %vm345_vm14 = vcmp.gt.f32.partialorder %v1867_v8, 0.0 }
  0xe5   :  { %v1384_v15 = vpop.f32.mrf.mxu1  ;;  %v329_v22 = vadd.f32 %v1366_v14, %v163_v25  ;;  %v671_v25 = vmul.f32 0.2, %v1851_v13  ;;  %v614_v14 = vadd.f32 %v613_v6, %v1813_v38  ;;  %v361_v6 = vmul.f32 0.2, %v1867_v8 }
  0xe6   :  { %v638_v23 = vadd.f32 %v1384_v15, %v472_v26  ;;  %v320_v24 = vpop.f32.mrf.mxu0  ;;  %vm653_vm13 = vcmp.gt.f32.partialorder %v1873_v42, 0.0 }
  0xe7   :  { %v629_v47 = vpop.f32.mrf.mxu1  ;;  %v321_v45 = vadd.f32 %v320_v24, %v153_v32  ;;  %vm349_vm3 = vcmp.gt.f32.partialorder %v329_v22, 0.0  ;;  %v365_v26 = vmul.f32 0.2, %v329_v22  ;;  %v308_v24 = vadd.f32 %v1849_v9, %v1815_v39 }
  0xe8   :  { %v630_v46 = vadd.f32 %v629_v47, %v1809_v30  ;;  %v1367_v44 = vpop.f32.mrf.mxu0  ;;  %vm658_vm4 = vcmp.gt.f32.partialorder %v638_v23, 0.0  ;;  %v674_v43 = vmul.f32 0.2, %v638_v23  ;;  %v687_v38 = vsel %vm655_vm2, %v1851_v13, %v671_v25 }
  0xe9   :  { %v1385_v52 = vpop.f32.mrf.mxu1  ;;  %v363_v36 = vmul.f32 0.2, %v321_v45  ;;  %v332_v32 = vadd.f32 %v1367_v44, %v1803_v27  ;;  %v381_v61 = vsel %vm349_vm3, %v329_v22, %v365_v26  ;;  %vm347_vm10 = vcmp.gt.f32.partialorder %v321_v45, 0.0 }
  0xea   :  { %v641_v30 = vadd.f32 %v1385_v52, %v1805_v28  ;;  %v323_v34 = vpop.f32.mrf.mxu0  ;;  %vm656_vm5 = vcmp.gt.f32.partialorder %v630_v46, 0.0  ;;  %v672_v47 = vmul.f32 0.2, %v630_v46  ;;  %v690_v28 = vsel %vm658_vm4, %v638_v23, %v674_v43 }
  0xeb   :  { %v632_v35 = vpop.f32.mrf.mxu1  ;;  %v324_v37 = vadd.f32 %v323_v34, %v1811_v31  ;;  %vm350_vm6 = vcmp.gt.f32.partialorder %v332_v32, 0.0  ;;  %v366_v56 = vmul.f32 0.2, %v332_v32  ;;  %v362_v22 = vmul.f32 0.2, %v1870_v49 }
  0xec   :  { %v633_v55 = vadd.f32 %v632_v35, %v1807_v29  ;;  %vm659_vm7 = vcmp.gt.f32.partialorder %v641_v30, 0.0  ;;  %v675_v58 = vmul.f32 0.2, %v641_v30  ;;  %v688_v31 = vsel %vm656_vm5, %v630_v46, %v672_v47 }
  0xed   :  { %v364_v1 = vmul.f32 0.2, %v324_v37  ;;  %v382_v27 = vsel %vm350_vm6, %v332_v32, %v366_v56  ;;  %vm348_vm9 = vcmp.gt.f32.partialorder %v324_v37, 0.0  ;;  %v670_v29 = vmul.f32 0.2, %v622_v4 }
  0xee   :  { %vm657_vm8 = vcmp.gt.f32.partialorder %v633_v55, 0.0  ;;  %v673_v2 = vmul.f32 0.2, %v633_v55  ;;  %v691_v7 = vsel %vm659_vm7, %v641_v30, %v675_v58  ;;  %v699_v10 = vpack.c.bf16 %v382_v27, %v381_v61 }
  0xef   :  { %v707_v11 = vpack.c.bf16 %v691_v7, %v690_v28  ;;  %v380_v44 = vsel %vm348_vm9, %v324_v37, %v364_v1  ;;  %v609_v23 = vadd.f32 %v1839_v62, %v1819_v41  ;;  %v669_v46 = vmul.f32 0.2, %v1873_v42 }
  0xf0   :  { %v689_v12 = vsel %vm657_vm8, %v633_v55, %v673_v2  ;;  %v305_v39 = vadd.f32 %v1847_v5, %v1817_v40  ;;  %v379_v9 = vsel %vm347_vm10, %v321_v45, %v363_v36  ;;  %v668_v41 = vmul.f32 0.2, %v614_v14 }
  0xf1   :  { %v706_v15 = vpack.c.bf16 %v689_v12, %v688_v31  ;;  %1286 = vmatprep.subr.bf16.mxu0 %v707_v11  ;;  %1386 = vmatprep.subr.bf16.mxu1 %v707_v11  ;;  %v698_v62 = vpack.c.bf16 %v380_v44, %v379_v9  ;;  %v686_v52 = vsel %vm654_vm11, %v622_v4, %v670_v29  ;;  %vm652_vm15 = vcmp.gt.f32.partialorder %v614_v14, 0.0 }
  0xf2   :  { %1287 = vmatpush3.bf16.msra.mxu0 %v699_v10  ;;  %1394 = vmatpush3.bf16.msra.mxu1 %v699_v10  ;;  %v378_v13 = vsel %vm346_vm12, %v1870_v49, %v362_v22  ;;  %v360_v25 = vmul.f32 0.2, %v308_v24  ;;  %v705_v26 = vpack.c.bf16 %v687_v38, %v686_v52  ;;  %v667_v40 = vmul.f32 0.2, %v609_v23  ;;  %v2090_v22 = vld [vmem:[#allocation6_spill] sm:$0xff] }
  0xf3   :  { %1288 = vmatprep.subr.bf16.mxu0 %v706_v15  ;;  %1387 = vmatprep.subr.bf16.mxu1 %v706_v15  ;;  %v601_v5 = vadd.f32 %v1843_v0, %v1827_v51  ;;  %vm344_vm0 = vcmp.gt.f32.partialorder %v308_v24, 0.0  ;;  %v685_v45 = vsel %vm653_vm13, %v1873_v42, %v669_v46  ;;  %vm650_vm2 = vcmp.gt.f32.partialorder %v1861_v20, 0.0 }
  0xf4   :  { %vm651_vm3 = vcmp.gt.f32.partialorder %v609_v23, 0.0  ;;  %v377_v4 = vsel %vm345_vm14, %v1867_v8, %v361_v6  ;;  %v359_v49 = vmul.f32 0.2, %v305_v39  ;;  %v666_v43 = vmul.f32 0.2, %v1861_v20  ;;  %v407_v8 = vpop.permute.xlu1 %406 }
  0xf5   :  { %vm343_vm4 = vcmp.gt.f32.partialorder %v305_v39, 0.0  ;;  %v697_v51 = vpack.c.bf16 %v378_v13, %v377_v4  ;;  %v684_v0 = vsel %vm652_vm15, %v614_v14, %v668_v41  ;;  %vm646_vm5 = vcmp.gt.f32.partialorder %v1855_v17, 0.0  ;;  %v1435_v4 = vld [vmem:[%s2084_s6 + $0x50] ss:$8 sps:$4 sm:$0xff]  }
  0xf6   :  { %1289 = vmatpush3.bf16.msra.mxu0 %v698_v62  ;;  %1395 = vmatpush3.bf16.msra.mxu1 %v698_v62  ;;  %v358_v42 = vmul.f32 0.2, %v1865_v33  ;;  %v292_v36 = vadd.f32 %v1841_v63, %v1835_v59  ;;  %v376_v32 = vsel %vm344_vm0, %v308_v24, %v360_v25  ;;  %v704_v30 = vpack.c.bf16 %v685_v45, %v684_v0  ;;  %v402_v63 = vpop.permute.xlu0 %401  ;;  %v1434_v45 = vld [vmem:[%s2084_s6 + $0x10] ss:$8 sps:$4 sm:$0xff]   ;;  %v1441_v0 = vld [vmem:[%s2084_s6 + $0x60] ss:$8 sps:$4 sm:$0xff]  }
  0xf7   :  { %1290 = vmatprep.subr.bf16.mxu0 %v705_v26  ;;  %1388 = vmatprep.subr.bf16.mxu1 %v705_v26  ;;  %v593_v34 = vadd.f32 %v1825_v50, %v1845_v3  ;;  %vm342_vm6 = vcmp.gt.f32.partialorder %v1865_v33, 0.0  ;;  %v665_v35 = vmul.f32 0.2, %v601_v5  ;;  %v683_v47 = vsel %vm651_vm3, %v609_v23, %v667_v40  ;;  %v1424_v26 = vld [vmem:[%s2084_s6] ss:$8 sps:$4 sm:$0xff]  }
  0xf8   :  { %v357_v37 = vmul.f32 0.2, %v1859_v19  ;;  %v289_v55 = vadd.f32 %v1833_v57, %v1837_v60  ;;  %vm649_vm7 = vcmp.gt.f32.partialorder %v601_v5, 0.0  ;;  %v375_v59 = vsel %vm343_vm4, %v305_v39, %v359_v49  ;;  %v1430_v40 = vld [vmem:[%s2084_s6 + $0x14] ss:$8 sps:$4 sm:$0xff]  }
  0xf9   :  { %vm341_vm8 = vcmp.gt.f32.partialorder %v1859_v19, 0.0  ;;  %v664_v50 = vmul.f32 0.2, %v1863_v21  ;;  %v696_v3 = vpack.c.bf16 %v376_v32, %v375_v59  ;;  %v682_v56 = vsel %vm650_vm2, %v1861_v20, %v666_v43  ;;  %v1436_v49 = vld [vmem:[%s2084_s6 + $0x24] ss:$8 sps:$4 sm:$0xff]  }
  0xfa   :  { %1291 = vmatpush3.bf16.msra.mxu0 %v697_v51  ;;  %1396 = vmatpush3.bf16.msra.mxu1 %v697_v51  ;;  %vm648_vm9 = vcmp.gt.f32.partialorder %v1863_v21, 0.0  ;;  %v374_v57 = vsel %vm342_vm6, %v1865_v33, %v358_v42  ;;  %v356_v60 = vmul.f32 0.2, %v292_v36  ;;  %v703_v58 = vpack.c.bf16 %v683_v47, %v682_v56  ;;  %v98_v33 = vpop.permute.xlu1 %97  ;;  %v1438_v43 = vld [vmem:[%s2084_s6 + $0x64] ss:$8 sps:$4 sm:$0xff]  }
  0xfb   :  { %1292 = vmatprep.subr.bf16.mxu0 %v704_v30  ;;  %1389 = vmatprep.subr.bf16.mxu1 %v704_v30  ;;  %v663_v61 = vmul.f32 0.2, %v593_v34  ;;  %v585_v1 = vadd.f32 %v1831_v54, %v407_v8  ;;  %vm340_vm10 = vcmp.gt.f32.partialorder %v292_v36, 0.0  ;;  %v681_v2 = vsel %vm649_vm7, %v601_v5, %v665_v35  ;;  %v1432_v5 = vld [vmem:[%s2084_s6 + $0x54] ss:$8 sps:$4 sm:$0xff]  }
  0xfc   :  { %v662_v27 = vmul.f32 0.2, %v1855_v17  ;;  %vm647_vm11 = vcmp.gt.f32.partialorder %v593_v34, 0.0  ;;  %v373_v20 = vsel %vm341_vm8, %v1859_v19, %v357_v37  ;;  %v355_v28 = vmul.f32 0.2, %v289_v55  ;;  %v93_v19 = vpop.permute.xlu0 %92 }
  0xfd   :  { %v582_v7 = vadd.f32 %v1823_v48, %v402_v63  ;;  %vm339_vm12 = vcmp.gt.f32.partialorder %v289_v55, 0.0  ;;  %v695_v54 = vpack.c.bf16 %v374_v57, %v373_v20  ;;  %v680_v10 = vsel %vm648_vm9, %v1863_v21, %v664_v50  ;;  %v1440_v51 = vld [vmem:[%s2084_s6 + $0x20] ss:$8 sps:$4 sm:$0xff]   ;;  %v1442_v42 = vld [vmem:[%s2084_s6 + $0x34] ss:$8 sps:$4 sm:$0xff]  }
  0xfe   :  { %1293 = vmatpush3.bf16.msra.mxu0 %v696_v3  ;;  %1397 = vmatpush3.bf16.msra.mxu1 %v696_v3  ;;  %v354_v11 = vmul.f32 0.2, %v1857_v18  ;;  %v276_v31 = vadd.f32 %v1829_v53, %v98_v33  ;;  %v372_v12 = vsel %vm340_vm10, %v292_v36, %v356_v60  ;;  %v702_v29 = vpack.c.bf16 %v681_v2, %v680_v10  ;;  %v1444_v36 = vld [vmem:[%s2084_s6 + $0x74] ss:$8 sps:$4 sm:$0xff]   ;;  %v1446_v32 = vld [vmem:[%s2084_s6 + $0x30] ss:$8 sps:$4 sm:$0xff]  }
  0xff   :  { %1294 = vmatprep.subr.bf16.mxu0 %v703_v58  ;;  %1390 = vmatprep.subr.bf16.mxu1 %v703_v58  ;;  %vm338_vm13 = vcmp.gt.f32.partialorder %v1857_v18, 0.0  ;;  %v661_v14 = vmul.f32 0.2, %v585_v1  ;;  %v679_v48 = vsel %vm647_vm11, %v593_v34, %v663_v61  ;;  %v353_v15 = vmul.f32 0.2, %v1853_v16  ;;  %v748_v34 = vpop.permute.xlu1 %747 }
 0x100   :  { %v273_v24 = vadd.f32 %v2090_v22, %v93_v19  ;;  %vm645_vm14 = vcmp.gt.f32.partialorder %v585_v1, 0.0  ;;  %v371_v21 = vsel %vm339_vm12, %v289_v55, %v355_v28  ;;  %vm337_vm15 = vcmp.gt.f32.partialorder %v1853_v16, 0.0  ;;  %v1447_v30 = vld [vmem:[%s2084_s6 + $0x70] ss:$8 sps:$4 sm:$0xff]   ;;  %v743_v8 = vpop.permute.xlu0 %742 }
 0x101   :  { %v660_v53 = vmul.f32 0.2, %v582_v7  ;;  %v694_v44 = vpack.c.bf16 %v372_v12, %v371_v21  ;;  %v678_v23 = vsel %vm646_vm5, %v1855_v17, %v662_v27  ;;  %vm644_vm0 = vcmp.gt.f32.partialorder %v582_v7, 0.0 }
 0x102   :  { %1295 = vmatpush3.bf16.msra.mxu0 %v695_v54  ;;  %1398 = vmatpush3.bf16.msra.mxu1 %v695_v54  ;;  %v370_v46 = vsel %vm338_vm13, %v1857_v18, %v354_v11  ;;  %v352_v38 = vmul.f32 0.2, %v276_v31  ;;  %v701_v6 = vpack.c.bf16 %v679_v48, %v678_v23  ;;  %vm336_vm2 = vcmp.gt.f32.partialorder %v276_v31, 0.0 }
 0x103   :  { %1296 = vmatprep.subr.bf16.mxu0 %v702_v29  ;;  %1391 = vmatprep.subr.bf16.mxu1 %v702_v29  ;;  %v677_v39 = vsel %vm645_vm14, %v585_v1, %v661_v14  ;;  %v369_v9 = vsel %vm337_vm15, %v1853_v16, %v353_v15  ;;  %v351_v41 = vmul.f32 0.2, %v273_v24  ;;  %vm335_vm3 = vcmp.gt.f32.partialorder %v273_v24, 0.0  ;;  %v1427_v16 = vld [vmem:[%s2084_s6 + $0x40] ss:$8 sps:$4 sm:$0xff]   ;;  %v758_v47 = vpop.permute.xlu1 %757 }
 0x104   :  { %v693_v62 = vpack.c.bf16 %v370_v46, %v369_v9  ;;  %v676_v52 = vsel %vm644_vm0, %v582_v7, %v660_v53  ;;  %v368_v17 = vsel %vm336_vm2, %v276_v31, %v352_v38  ;;  %v753_v35 = vpop.permute.xlu0 %752 }
 0x105   :  { %v700_v13 = vpack.c.bf16 %v677_v39, %v676_v52  ;;  %v367_v25 = vsel %vm335_vm3, %v273_v24, %v351_v41 }
 0x106   :  { %1297 = vmatpush3.bf16.msra.mxu0 %v694_v44  ;;  %1399 = vmatpush3.bf16.msra.mxu1 %v694_v44  ;;  %v692_v18 = vpack.c.bf16 %v368_v17, %v367_v25 }
 0x107   :  { %1298 = vmatprep.subr.bf16.mxu0 %v701_v6  ;;  %1392 = vmatprep.subr.bf16.mxu1 %v701_v6  ;;  %v2007_v55 = vpop.permute.xlu1 %1068 }
 0x108   :  { %v2005_v37 = vpop.permute.xlu0 %1063 }
 0x10a   :  { %1299 = vmatpush3.bf16.msra.mxu0 %v693_v62  ;;  %1400 = vmatpush3.bf16.msra.mxu1 %v693_v62 }
 0x10b   :  { %1300 = vmatprep.subr.bf16.mxu0 %v700_v13  ;;  %1393 = vmatprep.subr.bf16.mxu1 %v700_v13  ;;  %v2009_v63 = vpop.permute.xlu1 %1073 }
 0x10c   :  { %v763_v59 = vpop.permute.xlu0 %762 }
 0x10e   :  { %1301 = vmatpush3.bf16.msra.mxu0 %v692_v18  ;;  %1401 = vmatpush3.bf16.msra.mxu1 %v692_v18 }
 0x10f   :  { %v2013_v3 = vpop.permute.xlu1 %1078 }
 0x110   :  { %v2011_v50 = vpop.permute.xlu0 %767 }
 0x111   :  { %933 = vmatmul.mubr.bf16.vlgmr.msra.gmra.mxu0 %v1424_v26  ;;  %965 = vmatmul.mubr.bf16.vlgmr.msra.gmra.mxu1 %v1427_v16 }
 0x112   :  { %940 = vmatprep.mubr.bf16.mxu0 %v1430_v40  ;;  %972 = vmatprep.mubr.bf16.mxu1 %v1432_v5 }
 0x113   :  { %v2017_v57 = vpop.permute.xlu1 %1083 }
 0x114   :  { %v2015_v56 = vpop.permute.xlu0 %772 }
 0x117   :  { %v2021_v58 = vpop.permute.xlu1 %1088 }
 0x118   :  { %v2019_v60 = vpop.permute.xlu0 %777 }
 0x119   :  { %941 = vmatmul.mubr.bf16.gmra.mxu0 %v1434_v45  ;;  %973 = vmatmul.mubr.bf16.gmra.mxu1 %v1435_v4 }
 0x11a   :  { %948 = vmatprep.mubr.bf16.mxu0 %v1436_v49  ;;  %980 = vmatprep.mubr.bf16.mxu1 %v1438_v43 }
 0x11b   :  { %v2023_v28 = vpop.permute.xlu1 %1093 }
 0x11c   :  { %v783_v61 = vpop.permute.xlu0 %782 }
 0x11f   :  { %v2027_v19 = vpop.permute.xlu1 %1098 }
 0x120   :  { %v2025_v54 = vpop.permute.xlu0 %787 }
 0x121   :  { %949 = vmatmul.mubr.bf16.gmra.mxu0 %v1440_v51  ;;  %981 = vmatmul.mubr.bf16.gmra.mxu1 %v1441_v0 }
 0x122   :  { %956 = vmatprep.mubr.bf16.mxu0 %v1442_v42  ;;  %988 = vmatprep.mubr.bf16.mxu1 %v1444_v36 }
 0x123   :  { %v2031_v39 = vpop.permute.xlu1 %1103 }
 0x124   :  { %v2029_v22 = vpop.permute.xlu0 %792 }
 0x127   :  { %v2035_v43 = vpop.permute.xlu1 %1108 }
 0x128   :  { %v2033_v17 = vpop.permute.xlu0 %797 }
 0x129   :  { %957 = vmatmul.mubr.bf16.gmra.mxu0 %v1446_v32  ;;  %989 = vmatmul.mubr.bf16.gmra.mxu1 %v1447_v30 }
 0x1d1   :  { %v1302_v1 = vpop.f32.mrf.mxu0  ;;  %v1326_v2 = vpop.f32.mrf.mxu1 }
 0x1d3   :  { %v1303_v27 = vpop.f32.mrf.mxu0  ;;  %v1327_v20 = vpop.f32.mrf.mxu1 }
 0x1d4   :  { %v1304_v14 = vadd.f32 %v1303_v27, %v1302_v1  ;;  %v1328_v25 = vadd.f32 %v1327_v20, %v1326_v2 }
 0x1d5   :  { %v1305_v33 = vpop.f32.mrf.mxu0  ;;  %v1329_v7 = vpop.f32.mrf.mxu1 }
 0x1d6   :  { %v935_v23 = vadd.f32 %v1304_v14, %v743_v8  ;;  %v967_v42 = vadd.f32 %v1328_v25, %v783_v61 }
 0x1d7   :  { %v1306_v10 = vpop.f32.mrf.mxu0  ;;  %v1330_v11 = vpop.f32.mrf.mxu1 }
 0x1d8   :  { %v1307_v31 = vadd.f32 %v1306_v10, %v1305_v33  ;;  %v1013_v13 = vmul.f32 0.2, %v935_v23  ;;  %vm997_vm5 = vcmp.gt.f32.partialorder %v935_v23, 0.0  ;;  %v1331_v2 = vadd.f32 %v1330_v11, %v1329_v7 }
 0x1d9   :  { %v1308_v12 = vpop.f32.mrf.mxu0  ;;  %v1332_v29 = vpop.f32.mrf.mxu1  ;;  %vm1005_vm9 = vcmp.gt.f32.partialorder %v967_v42, 0.0 }
 0x1da   :  { %v938_v21 = vadd.f32 %v1307_v31, %v748_v34  ;;  %v1029_v0 = vsel %vm997_vm5, %v935_v23, %v1013_v13  ;;  %v803_v34 = vpop.permute.xlu0 %802 }
 0x1db   :  { %v1309_v48 = vpop.f32.mrf.mxu0  ;;  %v1333_v15 = vpop.f32.mrf.mxu1  ;;  %v1141_v10 = vmul.f32 %v2005_v37, %v1029_v0 }
 0x1dc   :  { %v1310_v24 = vadd.f32 %v1309_v48, %v1308_v12  ;;  %v1014_v9 = vmul.f32 0.2, %v938_v21  ;;  %vm998_vm4 = vcmp.gt.f32.partialorder %v938_v21, 0.0  ;;  %v1021_v12 = vmul.f32 0.2, %v967_v42 }
 0x1dd   :  { %v1311_v53 = vpop.f32.mrf.mxu0  ;;  %v1335_v44 = vpop.f32.mrf.mxu1 }
 0x1de   :  { %v943_v46 = vadd.f32 %v1310_v24, %v753_v35  ;;  %v1030_v45 = vsel %vm998_vm4, %v938_v21, %v1014_v9  ;;  %v2043_v24 = vpop.permute.xlu1 %1113  ;;  %v970_v21 = vadd.f32 %v1331_v2, %v2025_v54  ;;  %v808_v23 = vpop.permute.xlu0 %807 }
 0x1df   :  { %v1312_v38 = vpop.f32.mrf.mxu0  ;;  %v1336_v6 = vpop.f32.mrf.mxu1  ;;  %v1142_v35 = vmul.f32 %v2007_v55, %v1030_v45 }
 0x1e0   :  { %v1313_v41 = vadd.f32 %v1312_v38, %v1311_v53  ;;  %v1015_v18 = vmul.f32 0.2, %v943_v46  ;;  %vm999_vm6 = vcmp.gt.f32.partialorder %v943_v46, 0.0  ;;  %v1337_v53 = vadd.f32 %v1336_v6, %v1335_v44 }
 0x1e1   :  { %v1314_v62 = vpop.f32.mrf.mxu0  ;;  %v1338_v52 = vpop.f32.mrf.mxu1  ;;  %v1158_v55 = vsel %vm519_vm1, %v1142_v35, 0.0  ;;  %v1037_v38 = vsel %vm1005_vm9, %v967_v42, %v1021_v12  ;;  %vm1006_vm12 = vcmp.gt.f32.partialorder %v970_v21, 0.0 }
 0x1e2   :  { %v946_v40 = vadd.f32 %v1313_v41, %v758_v47  ;;  %v1031_v36 = vsel %vm999_vm6, %v943_v46, %v1015_v18  ;;  %v1022_v18 = vmul.f32 0.2, %v970_v21 }
 0x1e3   :  { %v1315_v26 = vpop.f32.mrf.mxu0  ;;  %v1339_v16 = vpop.f32.mrf.mxu1  ;;  %v1143_v31 = vmul.f32 %v2009_v63, %v1031_v36 }
 0x1e4   :  { %v1316_v5 = vadd.f32 %v1315_v26, %v1314_v62  ;;  %vm1000_vm7 = vcmp.gt.f32.partialorder %v946_v40, 0.0  ;;  %v1016_v51 = vmul.f32 0.2, %v946_v40  ;;  %v1340_v44 = vadd.f32 %v1339_v16, %v1338_v52 }
 0x1e5   :  { %v1317_v4 = vpop.f32.mrf.mxu0  ;;  %v1341_v49 = vpop.f32.mrf.mxu1 }
 0x1e6   :  { %v951_v32 = vadd.f32 %v1316_v5, %v763_v59  ;;  %v1032_v47 = vsel %vm1000_vm7, %v946_v40, %v1016_v51  ;;  %v1334_v59 = vadd.f32 %v1333_v15, %v1332_v29  ;;  %v1160_v29 = vsel %vm519_vm1, %v1143_v31, 0.0 }
 0x1e7   :  { %v1318_v30 = vpop.f32.mrf.mxu0  ;;  %v1342_v8 = vpop.f32.mrf.mxu1  ;;  %v1144_v7 = vmul.f32 %v2013_v3, %v1032_v47  ;;  %v978_v40 = vadd.f32 %v1337_v53, %v2033_v17  ;;  %v983_v16 = vadd.f32 %v1340_v44, %v803_v34  ;;  %v1149_v34 = vmul.f32 %v2031_v39, %v1037_v38 }
 0x1e8   :  { %v1319_v1 = vadd.f32 %v1318_v30, %v1317_v4  ;;  %vm1001_vm8 = vcmp.gt.f32.partialorder %v951_v32, 0.0  ;;  %v1017_v27 = vmul.f32 0.2, %v951_v32  ;;  %v975_v3 = vadd.f32 %v1334_v59, %v2029_v22  ;;  %v1119_v4 = vpop.permute.xlu1 %1118 }
 0x1e9   :  { %v1320_v20 = vpop.f32.mrf.mxu0  ;;  %v1344_v33 = vpop.f32.mrf.mxu1  ;;  %v1162_v54 = vsel %vm519_vm1, %v1144_v7, 0.0  ;;  %v1343_v45 = vadd.f32 %v1342_v8, %v1341_v49  ;;  %v1038_v8 = vsel %vm1006_vm12, %v970_v21, %v1022_v18  ;;  %v1024_v35 = vmul.f32 0.2, %v978_v40 }
 0x1ea   :  { %v954_v61 = vadd.f32 %v1319_v1, %v2011_v50  ;;  %v1033_v14 = vsel %vm1001_vm8, %v951_v32, %v1017_v27  ;;  %v1157_v50 = vsel %vm519_vm1, %v1141_v10, 0.0  ;;  %v1023_v51 = vmul.f32 0.2, %v975_v3 }
 0x1eb   :  { %v1321_v48 = vpop.f32.mrf.mxu0  ;;  %v1345_v11 = vpop.f32.mrf.mxu1  ;;  %v1145_v15 = vmul.f32 %v2017_v57, %v1033_v14  ;;  %v1159_v9 = vadd.f32 %v1158_v55, %v1157_v50  ;;  %vm1007_vm14 = vcmp.gt.f32.partialorder %v975_v3, 0.0  ;;  %v986_v1 = vadd.f32 %v1343_v45, %v808_v23 }
 0x1ec   :  { %vm1002_vm10 = vcmp.gt.f32.partialorder %v954_v61, 0.0  ;;  %v1018_v37 = vmul.f32 0.2, %v954_v61  ;;  %v1322_v46 = vadd.f32 %v1321_v48, %v1320_v20  ;;  %v1346_v36 = vadd.f32 %v1345_v11, %v1344_v33  ;;  %v1124_v33 = vpop.permute.xlu1 %1123 }
 0x1ed   :  { %v1323_v63 = vpop.f32.mrf.mxu0  ;;  %v1347_v25 = vpop.f32.mrf.mxu1  ;;  %v1161_v26 = vadd.f32 %v1160_v29, %v1159_v9  ;;  %v1164_v5 = vsel %vm519_vm1, %v1145_v15, 0.0  ;;  %vm1008_vm15 = vcmp.gt.f32.partialorder %v978_v40, 0.0  ;;  %v1039_v10 = vsel %vm1007_vm14, %v975_v3, %v1023_v51 }
 0x1ee   :  { %v1034_v41 = vsel %vm1002_vm10, %v954_v61, %v1018_v37  ;;  %v959_v13 = vadd.f32 %v1322_v46, %v2015_v56  ;;  %v1025_v31 = vmul.f32 0.2, %v983_v16  ;;  %v1150_v59 = vmul.f32 %v2035_v43, %v1038_v8 }
 0x1ef   :  { %v1324_v62 = vpop.f32.mrf.mxu0  ;;  %v1146_v6 = vmul.f32 %v2021_v58, %v1034_v41  ;;  %v1163_v0 = vadd.f32 %v1162_v54, %v1161_v26  ;;  %v813_v58 = vpop.permute.xlu0 %812  ;;  %vm1009_vm0 = vcmp.gt.f32.partialorder %v983_v16, 0.0  ;;  %v1040_v48 = vsel %vm1008_vm15, %v978_v40, %v1024_v35 }
 0x1f0   :  { %v1325_v57 = vadd.f32 %v1324_v62, %v1323_v63  ;;  %vm1003_vm11 = vcmp.gt.f32.partialorder %v959_v13, 0.0  ;;  %v1019_v22 = vmul.f32 0.2, %v959_v13  ;;  %v1348_v32 = vpop.f32.mrf.mxu1  ;;  %v991_v61 = vadd.f32 %v1346_v36, %v813_v58  ;;  %v1129_v43 = vpop.permute.xlu1 %1128 }
 0x1f1   :  { %v1166_v56 = vsel %vm519_vm1, %v1146_v6, 0.0  ;;  %v1165_v17 = vadd.f32 %v1164_v5, %v1163_v0  ;;  %v1349_v27 = vadd.f32 %v1348_v32, %v1347_v25  ;;  %v1026_v55 = vmul.f32 0.2, %v986_v1 }
 0x1f2   :  { %v962_v52 = vadd.f32 %v1325_v57, %v2019_v60  ;;  %v1035_v42 = vsel %vm1003_vm11, %v959_v13, %v1019_v22  ;;  %v1172_v39 = vsel %vm519_vm1, %v1149_v34, 0.0  ;;  %v1151_v21 = vmul.f32 %v2043_v24, %v1039_v10 }
 0x1f3   :  { %v1147_v30 = vmul.f32 %v2023_v28, %v1035_v42  ;;  %v1167_v2 = vadd.f32 %v1166_v56, %v1165_v17  ;;  %v818_v12 = vpop.permute.xlu0 %817  ;;  %vm1010_vm2 = vcmp.gt.f32.partialorder %v986_v1, 0.0  ;;  %v1027_v53 = vmul.f32 0.2, %v991_v61 }
 0x1f4   :  { %vm1004_vm13 = vcmp.gt.f32.partialorder %v962_v52, 0.0  ;;  %v1020_v49 = vmul.f32 0.2, %v962_v52  ;;  %v994_v11 = vadd.f32 %v1349_v27, %v818_v12  ;;  %v1174_v63 = vsel %vm519_vm1, %v1150_v59, 0.0  ;;  %v1139_v25 = vpop.permute.xlu1 %1138 }
 0x1f5   :  { %v1168_v47 = vsel %vm519_vm1, %v1147_v30, 0.0  ;;  %v1152_v23 = vmul.f32 %v1119_v4, %v1040_v48  ;;  %vm1011_vm3 = vcmp.gt.f32.partialorder %v991_v61, 0.0  ;;  %v1042_v50 = vsel %vm1010_vm2, %v986_v1, %v1026_v55 }
 0x1f6   :  { %v1036_v60 = vsel %vm1004_vm13, %v962_v52, %v1020_v49  ;;  %v1169_v28 = vadd.f32 %v1168_v47, %v1167_v2  ;;  %v1028_v15 = vmul.f32 0.2, %v994_v11  ;;  %v1176_v46 = vsel %vm519_vm1, %v1151_v21, 0.0 }
 0x1f7   :  { %v1148_v20 = vmul.f32 %v2027_v19, %v1036_v60  ;;  %v1041_v19 = vsel %vm1009_vm0, %v983_v16, %v1025_v31  ;;  %vm1012_vm4 = vcmp.gt.f32.partialorder %v994_v11, 0.0  ;;  %v1043_v9 = vsel %vm1011_vm3, %v991_v61, %v1027_v53  ;;  %v1134_v62 = vpop.permute.xlu0 %1133 }
 0x1f8   :  { %v1153_v38 = vmul.f32 %v1124_v33, %v1041_v19  ;;  %v1178_v24 = vsel %vm519_vm1, %v1152_v23, 0.0  ;;  %v1154_v41 = vmul.f32 %v1129_v43, %v1042_v50  ;;  %v1044_v54 = vsel %vm1012_vm4, %v994_v11, %v1028_v15 }
 0x1f9   :  { %v1170_v14 = vsel %vm519_vm1, %v1148_v20, 0.0  ;;  %v1155_v13 = vmul.f32 %v1134_v62, %v1043_v9  ;;  %v1156_v40 = vmul.f32 %v1139_v25, %v1044_v54  ;;  %v1195_v56 = vstv %s2087_s9 }
 0x1fa   :  { %v1171_v7 = vadd.f32 %v1170_v14, %v1169_v28  ;;  %v1180_v6 = vsel %vm519_vm1, %v1153_v38, 0.0  ;;  %v1182_v26 = vsel %vm519_vm1, %v1154_v41, 0.0 }
 0x1fb   :  { %v1184_v5 = vsel %vm519_vm1, %v1155_v13, 0.0  ;;  %v1186_v22 = vsel %vm519_vm1, %v1156_v40, 0.0  ;;  %vm1203_vm1 = vcmask 57344  }
 0x1fc   :  { %v1173_v37 = vadd.f32 %v1172_v39, %v1171_v7 }
 0x1fe   :  { %v1175_v29 = vadd.f32 %v1174_v63, %v1173_v37 }
 0x200   :  { %v1177_v3 = vadd.f32 %v1176_v46, %v1175_v29 }
 0x202   :  { %v1179_v44 = vadd.f32 %v1178_v24, %v1177_v3 }
 0x204   :  { %v1181_v18 = vadd.f32 %v1180_v6, %v1179_v44 }
 0x206   :  { %v1183_v57 = vadd.f32 %v1182_v26, %v1181_v18 }
 0x208   :  { %v1185_v45 = vadd.f32 %v1184_v5, %v1183_v57 }
 0x20a   :  { %v1187_v4 = vadd.f32 %v1186_v22, %v1185_v45 }
 0x20c   :  { %v1188_v51 = vrot.slane %v1187_v4, 4 }
 0x20e   :  { %v1189_v0 = vadd.f32 %v1188_v51, %v1187_v4 }
 0x210   :  { %v1190_v52 = vrot.slane %v1189_v0, 2 }
 0x212   :  { %v1191_v58 = vadd.f32 %v1190_v52, %v1189_v0 }
 0x214   :  { %v1192_v16 = vrot.slane %v1191_v58, 1 }
 0x216   :  { %v1193_v42 = vadd.f32 %v1192_v16, %v1191_v58 }
 0x218   :  { %v1196_v36 = vadd.f32 %v1195_v56, %v1193_v42 }
 0x21a   :  { %v1267_v32 = vmul.f32 -1.442695, %v1196_v36 }
 0x21c   :  { %1448 = vpow2.f32 %v1267_v32 }
 0x229   :  { %v1449_v17 = vpop.eup %1448 }
 0x22a   :  { %v1200_v30 = vadd.f32 1.0, %v1449_v17 }
 0x22c   :  { %1450 = vrcp.f32 %v1200_v30 }
 0x239   :  { %v1451_v49 = vpop.eup %1450 }
 0x23a   :  { %1204 = vst.msk [vmem:[#allocation3] sm:$0x1] %vm1203_vm1, %v1451_v49 }
 0x23b   :  { %1463 = shalt.err (!%p1460_p4)
}
 0x23c   :  { %1214 = dma.vmem_to_hbm [thread:$0]  %s1212_s13, 16, %s2088_s10, [#allocation4]  }
 0x23d   :  { %1472 = dma.done.wait [#allocation4], 16  }
 0x23e   :  { %1473 = vsyncadd [#allocation4], 4294967280 }
 0x23f   :  { %1218 = vsyncpa [#allocation4], 1 }

</bundles_post_ra>
